<compile_context>
chip_gen: v5e
topology: v5e:2x2
jax: 0.10.0
libtpu: 0.0.40
codegen_flags: <defaults>
</compile_context>

<pallas_src>
import math

import jax
import jax.numpy as jnp
from jax.experimental import pallas as pl
from jax.experimental.pallas import tpu as pltpu


# --------------------------------------------------------------------------
# Kernel
# --------------------------------------------------------------------------
def _make_kernel(N, S, D, H):
    Dh = D // H
    NS = N * S
    eps = 1e-5

    def kernel(x_ref, ln1w_ref, ln1b_ref, wqkv_ref, bqkv_ref, wo_ref, bo_ref,
               ln2w_ref, ln2b_ref, wfc_ref, bfc_ref, wpr_ref, bpr_ref,
               o_ref, xs_ref):
        layer = pl.program_id(0)

        # Load the activation slab once (layer 0); carried in fp32 scratch
        # across all layers.
        @pl.when(layer == 0)
        def _():
            xs_ref[...] = x_ref[...].astype(jnp.float32)

        x = xs_ref[...].reshape(NS, D)                         # (N*S, D) fp32

        def layernorm(v, w, b):                                # fp32 LayerNorm
            mu = jnp.mean(v, axis=-1, keepdims=True)
            var = jnp.mean(jnp.square(v - mu), axis=-1, keepdims=True)
            return (v - mu) * jax.lax.rsqrt(var + eps) * w + b

        # ------------------ attention branch ------------------
        xn = layernorm(x, ln1w_ref[...], ln1b_ref[...]).astype(jnp.bfloat16)
        # fused QKV projection; 1/sqrt(Dh) pre-folded into the Q columns.
        qkv = jnp.dot(xn, wqkv_ref[...],
                      preferred_element_type=jnp.float32) + bqkv_ref[...]
        qkv = qkv.astype(jnp.bfloat16).reshape(N, S, 3 * D)    # matmul operands
        wo = wo_ref[...]                                       # (D, D) bf16

        attn = jnp.zeros((NS, D), jnp.float32)
        for h in range(H):                                     # static unroll
            q = qkv[:, :, h * Dh:(h + 1) * Dh]                 # (N, S, Dh)
            k = qkv[:, :, D + h * Dh:D + (h + 1) * Dh]         # (N, S, Dh)
            v = qkv[:, :, 2 * D + h * Dh:2 * D + (h + 1) * Dh]
            # batched Q @ K^T, contraction on last axes (no transpose).
            s = jnp.einsum('nqd,nkd->nqk', q, k,
                           preferred_element_type=jnp.float32)
            s = s - jnp.max(s, axis=-1, keepdims=True)         # fp32 softmax
            p = jnp.exp(s)
            p = p * pl.reciprocal(jnp.sum(p, axis=-1, keepdims=True),
                                  approx=True)
            o_h = jnp.einsum('nqk,nkd->nqd', p.astype(jnp.bfloat16), v,
                             preferred_element_type=jnp.float32)  # (N, S, Dh)
            # accumulate straight into the output projection (no concat)
            attn = attn + jnp.dot(o_h.reshape(NS, Dh).astype(jnp.bfloat16),
                                  wo[h * Dh:(h + 1) * Dh, :],
                                  preferred_element_type=jnp.float32)
        x = x + attn + bo_ref[...]                             # residual 1

        # ------------------ MLP branch ------------------
        xn2 = layernorm(x, ln2w_ref[...], ln2b_ref[...]).astype(jnp.bfloat16)
        hdn = jnp.dot(xn2, wfc_ref[...],
                      preferred_element_type=jnp.float32) + bfc_ref[...]
        hdn = hdn * jax.nn.sigmoid(1.702 * hdn)                # QuickGELU fp32
        y = jnp.dot(hdn.astype(jnp.bfloat16), wpr_ref[...],
                    preferred_element_type=jnp.float32) + bpr_ref[...]
        x = x + y                                              # residual 2

        xs_ref[...] = x.reshape(N, S, D)

        # Output block index is constant across the grid => single HBM
        # write-back at the end; only store on the final layer.
        @pl.when(layer == pl.num_programs(0) - 1)
        def _():
            o_ref[...] = x.reshape(N, S, D).astype(o_ref.dtype)

    return kernel


# --------------------------------------------------------------------------
# Wrapper
# --------------------------------------------------------------------------
def _vmem_limit_bytes(N, S, D):
    """Working-set-based VMEM limit, capped by the chip's reported capacity."""
    try:
        cap = int(pltpu.get_tpu_info().vmem_capacity_bytes)
    except Exception:
        cap = 64 * 1024 * 1024
    NS = N * S
    wset = 2 * 12 * D * D * 2              # double-buffered bf16 weight mats
    wset += 2 * 16 * D * 4                 # biases + LN params (fp32)
    wset += NS * (3 * D + 4 * D) * (4 + 2)  # qkv / hdn fp32 + bf16 copies
    wset += 4 * N * S * S * 4              # per-head score / prob tiles
    wset += 8 * NS * D * 4                 # x in/out, fp32 carry, temporaries
    limit = int(wset * 1.5) + (8 << 20)    # headroom
    return max(32 * 1024 * 1024, min(limit, int(0.85 * cap)))


def transformer_forward(x_lnd, packed, heads):
    """x_lnd: (L, N, D) as in the PyTorch module. Returns (L, N, D)."""
    x = jnp.transpose(x_lnd, (1, 0, 2))                 # (N, L, D)
    N, S, D = x.shape
    n_layers = packed["w_qkv"].shape[0]
    kernel = _make_kernel(N, S, D, heads)

    weights = (packed["ln1_w"], packed["ln1_b"],
               packed["w_qkv"], packed["b_qkv"],
               packed["w_out"], packed["b_out"],
               packed["ln2_w"], packed["ln2_b"],
               packed["w_fc"], packed["b_fc"],
               packed["w_pr"], packed["b_pr"])

    def wspec(arr):
        nd = arr.ndim - 1
        return pl.BlockSpec((pl.Squeezed(),) + arr.shape[1:],
                            lambda l, _nd=nd: (l,) + (0,) * _nd)

    act_spec = pl.BlockSpec((N, S, D), lambda l: (0, 0, 0))

    out = pl.pallas_call(
        kernel,
        out_shape=jax.ShapeDtypeStruct((N, S, D), x.dtype),
        grid_spec=pltpu.PrefetchScalarGridSpec(
            num_scalar_prefetch=0,
            grid=(n_layers,),                            # layers streamed once
            in_specs=[act_spec] + [wspec(w) for w in weights],
            out_specs=pl.BlockSpec((N, S, D), lambda l: (0, 0, 0)),
            scratch_shapes=[pltpu.VMEM((N, S, D), jnp.float32)]),
        compiler_params=pltpu.CompilerParams(
            dimension_semantics=("arbitrary",),
            vmem_limit_bytes=_vmem_limit_bytes(N, S, D)),
    )(x, *weights)
    return jnp.transpose(out, (1, 0, 2))


# --------------------------------------------------------------------------
# Parameters: raw (PyTorch shapes, fp32) + packed (kernel layout, bf16 mats)
# --------------------------------------------------------------------------
def init_raw_params(key, width, layers):
    D = width
    raw = []
    for i in range(layers):
        k = jax.random.fold_in(key, i)
        ks = jax.random.split(k, 10)
        raw.append({
            "ln1_w": 1.0 + 0.1 * jax.random.normal(ks[0], (D,), jnp.float32),
            "ln1_b": 0.05 * jax.random.normal(ks[1], (D,), jnp.float32),
            "in_proj_w": 0.02 * jax.random.normal(ks[2], (3 * D, D), jnp.float32),
            "in_proj_b": 0.02 * jax.random.normal(ks[3], (3 * D,), jnp.float32),
            "out_w": 0.02 * jax.random.normal(ks[4], (D, D), jnp.float32),
            "out_b": 0.02 * jax.random.normal(ks[5], (D,), jnp.float32),
            "ln2_w": 1.0 + 0.1 * jax.random.normal(ks[6], (D,), jnp.float32),
            "ln2_b": 0.05 * jax.random.normal(ks[7], (D,), jnp.float32),
            "fc_w": 0.02 * jax.random.normal(ks[8], (4 * D, D), jnp.float32),
            "fc_b": 0.02 * jax.random.normal(ks[9], (4 * D,), jnp.float32),
            "proj_w": 0.02 * jax.random.normal(
                jax.random.fold_in(k, 100), (D, 4 * D), jnp.float32),
            "proj_b": 0.02 * jax.random.normal(
                jax.random.fold_in(k, 101), (D,), jnp.float32),
        })
    return raw


def pack_params(raw, heads):
    """Stack per-layer params with a leading layer axis, transpose linear
    weights so the kernel computes x @ W, fold 1/sqrt(Dh) into the Q slice of
    the fused QKV projection, cast weight matrices to bf16 and reshape biases /
    LN params to lane-dense (1, n) tiles."""
    D = raw[0]["ln1_w"].shape[0]
    Dh = D // heads
    scale = 1.0 / math.sqrt(Dh)
    qscale = jnp.concatenate(
        [jnp.full((D,), scale, jnp.float32), jnp.ones((2 * D,), jnp.float32)])

    def stk(fn):
        return jnp.stack([fn(p) for p in raw], axis=0)

    return {
        "ln1_w": stk(lambda p: p["ln1_w"][None, :]),
        "ln1_b": stk(lambda p: p["ln1_b"][None, :]),
        "w_qkv": stk(lambda p: (p["in_proj_w"] * qscale[:, None]).T
                     .astype(jnp.bfloat16)),                      # (D, 3D)
        "b_qkv": stk(lambda p: (p["in_proj_b"] * qscale)[None, :]),
        "w_out": stk(lambda p: p["out_w"].T.astype(jnp.bfloat16)),  # (D, D)
        "b_out": stk(lambda p: p["out_b"][None, :]),
        "ln2_w": stk(lambda p: p["ln2_w"][None, :]),
        "ln2_b": stk(lambda p: p["ln2_b"][None, :]),
        "w_fc": stk(lambda p: p["fc_w"].T.astype(jnp.bfloat16)),    # (D, 4D)
        "b_fc": stk(lambda p: p["fc_b"][None, :]),
        "w_pr": stk(lambda p: p["proj_w"].T.astype(jnp.bfloat16)),  # (4D, D)
        "b_pr": stk(lambda p: p["proj_b"][None, :]),
    }


# --------------------------------------------------------------------------
# Pure-JAX reference (fp32, PyTorch semantics) for the sanity check
# --------------------------------------------------------------------------
def _reference_block(x, p, heads):
    N, L, D = x.shape
    Dh = D // heads

    def ln(v, w, b):
        mu = v.mean(-1, keepdims=True)
        var = ((v - mu) ** 2).mean(-1, keepdims=True)
        return (v - mu) / jnp.sqrt(var + 1e-5) * w + b

    xn = ln(x, p["ln1_w"], p["ln1_b"])
    qkv = xn @ p["in_proj_w"].T + p["in_proj_b"]
    q, k, v = jnp.split(qkv, 3, axis=-1)
    q = q.reshape(N, L, heads, Dh) / math.sqrt(Dh)
    k = k.reshape(N, L, heads, Dh)
    v = v.reshape(N, L, heads, Dh)
    s = jnp.einsum("nqhd,nkhd->nhqk", q, k)
    pmat = jax.nn.softmax(s, axis=-1)
    o = jnp.einsum("nhqk,nkhd->nqhd", pmat, v).reshape(N, L, D)
    x = x + (o @ p["out_w"].T + p["out_b"])
    xn2 = ln(x, p["ln2_w"], p["ln2_b"])
    h = xn2 @ p["fc_w"].T + p["fc_b"]
    h = h * jax.nn.sigmoid(1.702 * h)
    return x + (h @ p["proj_w"].T + p["proj_b"])


def _reference_forward(x_lnd, raw_params, heads):
    x = jnp.transpose(x_lnd, (1, 0, 2))
    for p in raw_params:
        x = _reference_block(x, p, heads)
    return jnp.transpose(x, (1, 0, 2))


# --------------------------------------------------------------------------
if __name__ == "__main__":
    # Small shapes consistent with the module: seq=8, batch=2, width=32, heads=4
    L, N, D, H, LAYERS = 8, 2, 32, 4, 2

    key = jax.random.PRNGKey(0)
    kx, kp = jax.random.split(key)
    x = jax.random.normal(kx, (L, N, D), dtype=jnp.float32)   # (seq, batch, width)

    raw_params = init_raw_params(kp, D, LAYERS)
    packed = pack_params(raw_params, H)

    out = transformer_forward(x, packed, H)
    out = jax.block_until_ready(out)

    ref = _reference_forward(x, raw_params, H)
    assert out.shape == (L, N, D)
    max_err = jnp.max(jnp.abs(out - ref))
    # bf16 matmuls => loosened tolerance vs the fp32 reference.
    assert jnp.allclose(out, ref, atol=2e-2, rtol=2e-2), \
        f"mismatch vs reference (max abs err {max_err})"

    print("KERNEL_OK")
</pallas_src>

<mosaic_0001>
module attributes {stable_mosaic.version = 11 : i64} {
  func.func @kernel(%arg0: i32, %arg1: memref<2x8x32xf32, #tpu.memory_space<vmem>>, %arg2: memref<1x1x32xf32, #tpu.memory_space<vmem>>, %arg3: memref<1x1x32xf32, #tpu.memory_space<vmem>>, %arg4: memref<1x32x96xbf16, #tpu.memory_space<vmem>>, %arg5: memref<1x1x96xf32, #tpu.memory_space<vmem>>, %arg6: memref<1x32x32xbf16, #tpu.memory_space<vmem>>, %arg7: memref<1x1x32xf32, #tpu.memory_space<vmem>>, %arg8: memref<1x1x32xf32, #tpu.memory_space<vmem>>, %arg9: memref<1x1x32xf32, #tpu.memory_space<vmem>>, %arg10: memref<1x32x128xbf16, #tpu.memory_space<vmem>>, %arg11: memref<1x1x128xf32, #tpu.memory_space<vmem>>, %arg12: memref<1x128x32xbf16, #tpu.memory_space<vmem>>, %arg13: memref<1x1x32xf32, #tpu.memory_space<vmem>>, %arg14: memref<2x8x32xf32, #tpu.memory_space<vmem>>, %arg15: memref<2x8x32xf32, #tpu.memory_space<vmem>>) attributes {dimension_semantics = [#tpu.dimension_semantics<arbitrary>], iteration_bounds = array<i64: 2>, scalar_prefetch = 0 : i64, scratch_operands = 1 : i64, tpu.core_type = #tpu.core_type<tc>, window_params = [{pipeline_mode = #tpu.pipeline_mode<synchronous>, transform_indices = @transform_0, window_bounds = array<i64: 2, 8, 32>}, {transform_indices = @transform_1, window_bounds = array<i64: 1, 1, 32>}, {transform_indices = @transform_2, window_bounds = array<i64: 1, 1, 32>}, {transform_indices = @transform_3, window_bounds = array<i64: 1, 32, 96>}, {transform_indices = @transform_4, window_bounds = array<i64: 1, 1, 96>}, {transform_indices = @transform_5, window_bounds = array<i64: 1, 32, 32>}, {transform_indices = @transform_6, window_bounds = array<i64: 1, 1, 32>}, {transform_indices = @transform_7, window_bounds = array<i64: 1, 1, 32>}, {transform_indices = @transform_8, window_bounds = array<i64: 1, 1, 32>}, {transform_indices = @transform_9, window_bounds = array<i64: 1, 32, 128>}, {transform_indices = @transform_10, window_bounds = array<i64: 1, 1, 128>}, {transform_indices = @transform_11, window_bounds = array<i64: 1, 128, 32>}, {transform_indices = @transform_12, window_bounds = array<i64: 1, 1, 32>}, {pipeline_mode = #tpu.pipeline_mode<synchronous>, transform_indices = @transform_13, window_bounds = array<i64: 2, 8, 32>}]} {
    %c0_i32 = arith.constant 0 : i32
    %0 = arith.cmpi eq, %arg0, %c0_i32 : i32
    %1 = arith.extui %0 : i1 to i32
    %c0_i32_0 = arith.constant 0 : i32
    %2 = arith.cmpi ne, %1, %c0_i32_0 : i32
    scf.if %2 {
      %c0_78 = arith.constant 0 : index
      %c0_79 = arith.constant 0 : index
      %c0_80 = arith.constant 0 : index
      %189 = vector.load %arg1[%c0_78, %c0_79, %c0_80] : memref<2x8x32xf32, #tpu.memory_space<vmem>>, vector<2x8x32xf32>
      %c0_81 = arith.constant 0 : index
      %c0_82 = arith.constant 0 : index
      %c0_83 = arith.constant 0 : index
      %190 = vector.load %arg15[%c0_81, %c0_82, %c0_83] : memref<2x8x32xf32, #tpu.memory_space<vmem>>, vector<2x8x32xf32>
      tpu.vector_store %arg15[%c0_81, %c0_82, %c0_83], %189 {strides = array<i32>} : memref<2x8x32xf32, #tpu.memory_space<vmem>>, vector<2x8x32xf32>,
    } else {
    }
    %c0 = arith.constant 0 : index
    %c0_1 = arith.constant 0 : index
    %c0_2 = arith.constant 0 : index
    %3 = vector.load %arg15[%c0, %c0_1, %c0_2] : memref<2x8x32xf32, #tpu.memory_space<vmem>>, vector<2x8x32xf32>
    %4 = vector.shape_cast %3 : vector<2x8x32xf32> to vector<16x32xf32>
    %c0_3 = arith.constant 0 : index
    %c0_4 = arith.constant 0 : index
    %c0_5 = arith.constant 0 : index
    %5 = vector.load %arg2[%c0_3, %c0_4, %c0_5] : memref<1x1x32xf32, #tpu.memory_space<vmem>>, vector<1x1x32xf32>
    %6 = vector.shape_cast %5 : vector<1x1x32xf32> to vector<1x32xf32>
    %c0_6 = arith.constant 0 : index
    %c0_7 = arith.constant 0 : index
    %c0_8 = arith.constant 0 : index
    %7 = vector.load %arg3[%c0_6, %c0_7, %c0_8] : memref<1x1x32xf32, #tpu.memory_space<vmem>>, vector<1x1x32xf32>
    %8 = vector.shape_cast %7 : vector<1x1x32xf32> to vector<1x32xf32>
    %cst = arith.constant dense<0.000000e+00> : vector<16xf32>
    %9 = vector.multi_reduction <add>, %4, %cst [1] : vector<16x32xf32> to vector<16xf32>
    %10 = vector.shape_cast %9 : vector<16xf32> to vector<16x1xf32>
    %cst_9 = arith.constant 3.200000e+01 : f32
    %11 = vector.broadcast %cst_9 : f32 to vector<16x1xf32>
    %12 = arith.divf %10, %11 : vector<16x1xf32>
    %13 = vector.broadcast %12 : vector<16x1xf32> to vector<16x32xf32>
    %14 = arith.subf %4, %13 : vector<16x32xf32>
    %15 = arith.mulf %14, %14 : vector<16x32xf32>
    %cst_10 = arith.constant dense<0.000000e+00> : vector<16xf32>
    %16 = vector.multi_reduction <add>, %15, %cst_10 [1] : vector<16x32xf32> to vector<16xf32>
    %17 = vector.shape_cast %16 : vector<16xf32> to vector<16x1xf32>
    %cst_11 = arith.constant 3.200000e+01 : f32
    %18 = vector.broadcast %cst_11 : f32 to vector<16x1xf32>
    %19 = arith.divf %17, %18 : vector<16x1xf32>
    %20 = vector.broadcast %12 : vector<16x1xf32> to vector<16x32xf32>
    %21 = arith.subf %4, %20 : vector<16x32xf32>
    %cst_12 = arith.constant 9.99999974E-6 : f32
    %22 = vector.broadcast %cst_12 : f32 to vector<16x1xf32>
    %23 = arith.addf %19, %22 : vector<16x1xf32>
    %24 = math.rsqrt %23 : vector<16x1xf32>
    %25 = vector.broadcast %24 : vector<16x1xf32> to vector<16x32xf32>
    %26 = arith.mulf %21, %25 : vector<16x32xf32>
    %27 = vector.broadcast %6 : vector<1x32xf32> to vector<16x32xf32>
    %28 = arith.mulf %26, %27 : vector<16x32xf32>
    %29 = vector.broadcast %8 : vector<1x32xf32> to vector<16x32xf32>
    %30 = arith.addf %28, %29 : vector<16x32xf32>
    %31 = arith.truncf %30 : vector<16x32xf32> to vector<16x32xbf16>
    %c0_13 = arith.constant 0 : index
    %c0_14 = arith.constant 0 : index
    %c0_15 = arith.constant 0 : index
    %32 = vector.load %arg4[%c0_13, %c0_14, %c0_15] : memref<1x32x96xbf16, #tpu.memory_space<vmem>>, vector<1x32x96xbf16>
    %33 = vector.shape_cast %32 : vector<1x32x96xbf16> to vector<32x96xbf16>
    %cst_16 = arith.constant dense<0.000000e+00> : vector<16x96xf32>
    %34 = tpu.matmul %31, %33, %cst_16 {dimension_numbers = #tpu.dot_dimension_numbers<[1], [0], [0], [1], [0, 0, 1, 1], [], []>} : vector<16x32xbf16>, vector<32x96xbf16>, vector<16x96xf32> -> vector<16x96xf32>
    %c0_17 = arith.constant 0 : index
    %c0_18 = arith.constant 0 : index
    %c0_19 = arith.constant 0 : index
    %35 = vector.load %arg5[%c0_17, %c0_18, %c0_19] : memref<1x1x96xf32, #tpu.memory_space<vmem>>, vector<1x1x96xf32>
    %36 = vector.shape_cast %35 : vector<1x1x96xf32> to vector<1x96xf32>
    %37 = vector.broadcast %36 : vector<1x96xf32> to vector<16x96xf32>
    %38 = arith.addf %34, %37 : vector<16x96xf32>
    %39 = arith.truncf %38 : vector<16x96xf32> to vector<16x96xbf16>
    %40 = vector.shape_cast %39 : vector<16x96xbf16> to vector<2x8x96xbf16>
    %c0_20 = arith.constant 0 : index
    %c0_21 = arith.constant 0 : index
    %c0_22 = arith.constant 0 : index
    %41 = vector.load %arg6[%c0_20, %c0_21, %c0_22] : memref<1x32x32xbf16, #tpu.memory_space<vmem>>, vector<1x32x32xbf16>
    %42 = vector.shape_cast %41 : vector<1x32x32xbf16> to vector<32x32xbf16>
    %cst_23 = arith.constant 0.000000e+00 : f32
    %43 = vector.broadcast %cst_23 : f32 to vector<16x32xf32>
    %44 = vector.extract_strided_slice %40 {offsets = [0, 0, 0], sizes = [2, 8, 8], strides = [1, 1, 1]} : vector<2x8x96xbf16> to vector<2x8x8xbf16>
    %45 = vector.extract_strided_slice %40 {offsets = [0, 0, 32], sizes = [2, 8, 8], strides = [1, 1, 1]} : vector<2x8x96xbf16> to vector<2x8x8xbf16>
    %46 = vector.extract_strided_slice %40 {offsets = [0, 0, 64], sizes = [2, 8, 8], strides = [1, 1, 1]} : vector<2x8x96xbf16> to vector<2x8x8xbf16>
    "tpu.trace_start"() <{level = 10 : i32, message = "nqd,nkd->nqk"}> : () -> ()
    %cst_24 = arith.constant dense<0.000000e+00> : vector<2x8x8xf32>
    %47 = tpu.matmul %44, %45, %cst_24 {dimension_numbers = #tpu.dot_dimension_numbers<[2], [2], [1], [1], [0, 0, 0, 1, 1, 1], [0], [0]>} : vector<2x8x8xbf16>, vector<2x8x8xbf16>, vector<2x8x8xf32> -> vector<2x8x8xf32>
    "tpu.trace_stop"() : () -> ()
    %cst_25 = arith.constant dense<0xFF800000> : vector<2x8xf32>
    %48 = vector.multi_reduction <maximumf>, %47, %cst_25 [2] : vector<2x8x8xf32> to vector<2x8xf32>
    %49 = vector.shape_cast %48 : vector<2x8xf32> to vector<2x8x1xf32>
    %50 = vector.broadcast %49 : vector<2x8x1xf32> to vector<2x8x8xf32>
    %51 = arith.subf %47, %50 : vector<2x8x8xf32>
    %52 = math.exp %51 : vector<2x8x8xf32>
    %cst_26 = arith.constant dense<0.000000e+00> : vector<2x8xf32>
    %53 = vector.multi_reduction <add>, %52, %cst_26 [2] : vector<2x8x8xf32> to vector<2x8xf32>
    %54 = vector.shape_cast %53 : vector<2x8xf32> to vector<2x8x1xf32>
    %55 = tpu.reciprocal %54 {approx = true} : vector<2x8x1xf32> -> vector<2x8x1xf32>
    %56 = vector.broadcast %55 : vector<2x8x1xf32> to vector<2x8x8xf32>
    %57 = arith.mulf %52, %56 : vector<2x8x8xf32>
    %58 = arith.truncf %57 : vector<2x8x8xf32> to vector<2x8x8xbf16>
    "tpu.trace_start"() <{level = 10 : i32, message = "nqk,nkd->nqd"}> : () -> ()
    %cst_27 = arith.constant dense<0.000000e+00> : vector<2x8x8xf32>
    %59 = tpu.matmul %58, %46, %cst_27 {dimension_numbers = #tpu.dot_dimension_numbers<[2], [1], [1], [2], [0, 0, 0, 1, 1, 2], [0], [0]>} : vector<2x8x8xbf16>, vector<2x8x8xbf16>, vector<2x8x8xf32> -> vector<2x8x8xf32>
    "tpu.trace_stop"() : () -> ()
    %60 = vector.shape_cast %59 : vector<2x8x8xf32> to vector<16x8xf32>
    %61 = arith.truncf %60 : vector<16x8xf32> to vector<16x8xbf16>
    %62 = vector.extract_strided_slice %42 {offsets = [0, 0], sizes = [8, 32], strides = [1, 1]} : vector<32x32xbf16> to vector<8x32xbf16>
    %cst_28 = arith.constant dense<0.000000e+00> : vector<16x32xf32>
    %63 = tpu.matmul %61, %62, %cst_28 {dimension_numbers = #tpu.dot_dimension_numbers<[1], [0], [0], [1], [0, 0, 1, 1], [], []>} : vector<16x8xbf16>, vector<8x32xbf16>, vector<16x32xf32> -> vector<16x32xf32>
    %64 = arith.addf %43, %63 : vector<16x32xf32>
    %65 = vector.extract_strided_slice %40 {offsets = [0, 0, 8], sizes = [2, 8, 8], strides = [1, 1, 1]} : vector<2x8x96xbf16> to vector<2x8x8xbf16>
    %66 = vector.extract_strided_slice %40 {offsets = [0, 0, 40], sizes = [2, 8, 8], strides = [1, 1, 1]} : vector<2x8x96xbf16> to vector<2x8x8xbf16>
    %67 = vector.extract_strided_slice %40 {offsets = [0, 0, 72], sizes = [2, 8, 8], strides = [1, 1, 1]} : vector<2x8x96xbf16> to vector<2x8x8xbf16>
    "tpu.trace_start"() <{level = 10 : i32, message = "nqd,nkd->nqk"}> : () -> ()
    %cst_29 = arith.constant dense<0.000000e+00> : vector<2x8x8xf32>
    %68 = tpu.matmul %65, %66, %cst_29 {dimension_numbers = #tpu.dot_dimension_numbers<[2], [2], [1], [1], [0, 0, 0, 1, 1, 1], [0], [0]>} : vector<2x8x8xbf16>, vector<2x8x8xbf16>, vector<2x8x8xf32> -> vector<2x8x8xf32>
    "tpu.trace_stop"() : () -> ()
    %cst_30 = arith.constant dense<0xFF800000> : vector<2x8xf32>
    %69 = vector.multi_reduction <maximumf>, %68, %cst_30 [2] : vector<2x8x8xf32> to vector<2x8xf32>
    %70 = vector.shape_cast %69 : vector<2x8xf32> to vector<2x8x1xf32>
    %71 = vector.broadcast %70 : vector<2x8x1xf32> to vector<2x8x8xf32>
    %72 = arith.subf %68, %71 : vector<2x8x8xf32>
    %73 = math.exp %72 : vector<2x8x8xf32>
    %cst_31 = arith.constant dense<0.000000e+00> : vector<2x8xf32>
    %74 = vector.multi_reduction <add>, %73, %cst_31 [2] : vector<2x8x8xf32> to vector<2x8xf32>
    %75 = vector.shape_cast %74 : vector<2x8xf32> to vector<2x8x1xf32>
    %76 = tpu.reciprocal %75 {approx = true} : vector<2x8x1xf32> -> vector<2x8x1xf32>
    %77 = vector.broadcast %76 : vector<2x8x1xf32> to vector<2x8x8xf32>
    %78 = arith.mulf %73, %77 : vector<2x8x8xf32>
    %79 = arith.truncf %78 : vector<2x8x8xf32> to vector<2x8x8xbf16>
    "tpu.trace_start"() <{level = 10 : i32, message = "nqk,nkd->nqd"}> : () -> ()
    %cst_32 = arith.constant dense<0.000000e+00> : vector<2x8x8xf32>
    %80 = tpu.matmul %79, %67, %cst_32 {dimension_numbers = #tpu.dot_dimension_numbers<[2], [1], [1], [2], [0, 0, 0, 1, 1, 2], [0], [0]>} : vector<2x8x8xbf16>, vector<2x8x8xbf16>, vector<2x8x8xf32> -> vector<2x8x8xf32>
    "tpu.trace_stop"() : () -> ()
    %81 = vector.shape_cast %80 : vector<2x8x8xf32> to vector<16x8xf32>
    %82 = arith.truncf %81 : vector<16x8xf32> to vector<16x8xbf16>
    %83 = vector.extract_strided_slice %42 {offsets = [8, 0], sizes = [8, 32], strides = [1, 1]} : vector<32x32xbf16> to vector<8x32xbf16>
    %cst_33 = arith.constant dense<0.000000e+00> : vector<16x32xf32>
    %84 = tpu.matmul %82, %83, %cst_33 {dimension_numbers = #tpu.dot_dimension_numbers<[1], [0], [0], [1], [0, 0, 1, 1], [], []>} : vector<16x8xbf16>, vector<8x32xbf16>, vector<16x32xf32> -> vector<16x32xf32>
    %85 = arith.addf %64, %84 : vector<16x32xf32>
    %86 = vector.extract_strided_slice %40 {offsets = [0, 0, 16], sizes = [2, 8, 8], strides = [1, 1, 1]} : vector<2x8x96xbf16> to vector<2x8x8xbf16>
    %87 = vector.extract_strided_slice %40 {offsets = [0, 0, 48], sizes = [2, 8, 8], strides = [1, 1, 1]} : vector<2x8x96xbf16> to vector<2x8x8xbf16>
    %88 = vector.extract_strided_slice %40 {offsets = [0, 0, 80], sizes = [2, 8, 8], strides = [1, 1, 1]} : vector<2x8x96xbf16> to vector<2x8x8xbf16>
    "tpu.trace_start"() <{level = 10 : i32, message = "nqd,nkd->nqk"}> : () -> ()
    %cst_34 = arith.constant dense<0.000000e+00> : vector<2x8x8xf32>
    %89 = tpu.matmul %86, %87, %cst_34 {dimension_numbers = #tpu.dot_dimension_numbers<[2], [2], [1], [1], [0, 0, 0, 1, 1, 1], [0], [0]>} : vector<2x8x8xbf16>, vector<2x8x8xbf16>, vector<2x8x8xf32> -> vector<2x8x8xf32>
    "tpu.trace_stop"() : () -> ()
    %cst_35 = arith.constant dense<0xFF800000> : vector<2x8xf32>
    %90 = vector.multi_reduction <maximumf>, %89, %cst_35 [2] : vector<2x8x8xf32> to vector<2x8xf32>
    %91 = vector.shape_cast %90 : vector<2x8xf32> to vector<2x8x1xf32>
    %92 = vector.broadcast %91 : vector<2x8x1xf32> to vector<2x8x8xf32>
    %93 = arith.subf %89, %92 : vector<2x8x8xf32>
    %94 = math.exp %93 : vector<2x8x8xf32>
    %cst_36 = arith.constant dense<0.000000e+00> : vector<2x8xf32>
    %95 = vector.multi_reduction <add>, %94, %cst_36 [2] : vector<2x8x8xf32> to vector<2x8xf32>
    %96 = vector.shape_cast %95 : vector<2x8xf32> to vector<2x8x1xf32>
    %97 = tpu.reciprocal %96 {approx = true} : vector<2x8x1xf32> -> vector<2x8x1xf32>
    %98 = vector.broadcast %97 : vector<2x8x1xf32> to vector<2x8x8xf32>
    %99 = arith.mulf %94, %98 : vector<2x8x8xf32>
    %100 = arith.truncf %99 : vector<2x8x8xf32> to vector<2x8x8xbf16>
    "tpu.trace_start"() <{level = 10 : i32, message = "nqk,nkd->nqd"}> : () -> ()
    %cst_37 = arith.constant dense<0.000000e+00> : vector<2x8x8xf32>
    %101 = tpu.matmul %100, %88, %cst_37 {dimension_numbers = #tpu.dot_dimension_numbers<[2], [1], [1], [2], [0, 0, 0, 1, 1, 2], [0], [0]>} : vector<2x8x8xbf16>, vector<2x8x8xbf16>, vector<2x8x8xf32> -> vector<2x8x8xf32>
    "tpu.trace_stop"() : () -> ()
    %102 = vector.shape_cast %101 : vector<2x8x8xf32> to vector<16x8xf32>
    %103 = arith.truncf %102 : vector<16x8xf32> to vector<16x8xbf16>
    %104 = vector.extract_strided_slice %42 {offsets = [16, 0], sizes = [8, 32], strides = [1, 1]} : vector<32x32xbf16> to vector<8x32xbf16>
    %cst_38 = arith.constant dense<0.000000e+00> : vector<16x32xf32>
    %105 = tpu.matmul %103, %104, %cst_38 {dimension_numbers = #tpu.dot_dimension_numbers<[1], [0], [0], [1], [0, 0, 1, 1], [], []>} : vector<16x8xbf16>, vector<8x32xbf16>, vector<16x32xf32> -> vector<16x32xf32>
    %106 = arith.addf %85, %105 : vector<16x32xf32>
    %107 = vector.extract_strided_slice %40 {offsets = [0, 0, 24], sizes = [2, 8, 8], strides = [1, 1, 1]} : vector<2x8x96xbf16> to vector<2x8x8xbf16>
    %108 = vector.extract_strided_slice %40 {offsets = [0, 0, 56], sizes = [2, 8, 8], strides = [1, 1, 1]} : vector<2x8x96xbf16> to vector<2x8x8xbf16>
    %109 = vector.extract_strided_slice %40 {offsets = [0, 0, 88], sizes = [2, 8, 8], strides = [1, 1, 1]} : vector<2x8x96xbf16> to vector<2x8x8xbf16>
    "tpu.trace_start"() <{level = 10 : i32, message = "nqd,nkd->nqk"}> : () -> ()
    %cst_39 = arith.constant dense<0.000000e+00> : vector<2x8x8xf32>
    %110 = tpu.matmul %107, %108, %cst_39 {dimension_numbers = #tpu.dot_dimension_numbers<[2], [2], [1], [1], [0, 0, 0, 1, 1, 1], [0], [0]>} : vector<2x8x8xbf16>, vector<2x8x8xbf16>, vector<2x8x8xf32> -> vector<2x8x8xf32>
    "tpu.trace_stop"() : () -> ()
    %cst_40 = arith.constant dense<0xFF800000> : vector<2x8xf32>
    %111 = vector.multi_reduction <maximumf>, %110, %cst_40 [2] : vector<2x8x8xf32> to vector<2x8xf32>
    %112 = vector.shape_cast %111 : vector<2x8xf32> to vector<2x8x1xf32>
    %113 = vector.broadcast %112 : vector<2x8x1xf32> to vector<2x8x8xf32>
    %114 = arith.subf %110, %113 : vector<2x8x8xf32>
    %115 = math.exp %114 : vector<2x8x8xf32>
    %cst_41 = arith.constant dense<0.000000e+00> : vector<2x8xf32>
    %116 = vector.multi_reduction <add>, %115, %cst_41 [2] : vector<2x8x8xf32> to vector<2x8xf32>
    %117 = vector.shape_cast %116 : vector<2x8xf32> to vector<2x8x1xf32>
    %118 = tpu.reciprocal %117 {approx = true} : vector<2x8x1xf32> -> vector<2x8x1xf32>
    %119 = vector.broadcast %118 : vector<2x8x1xf32> to vector<2x8x8xf32>
    %120 = arith.mulf %115, %119 : vector<2x8x8xf32>
    %121 = arith.truncf %120 : vector<2x8x8xf32> to vector<2x8x8xbf16>
    "tpu.trace_start"() <{level = 10 : i32, message = "nqk,nkd->nqd"}> : () -> ()
    %cst_42 = arith.constant dense<0.000000e+00> : vector<2x8x8xf32>
    %122 = tpu.matmul %121, %109, %cst_42 {dimension_numbers = #tpu.dot_dimension_numbers<[2], [1], [1], [2], [0, 0, 0, 1, 1, 2], [0], [0]>} : vector<2x8x8xbf16>, vector<2x8x8xbf16>, vector<2x8x8xf32> -> vector<2x8x8xf32>
    "tpu.trace_stop"() : () -> ()
    %123 = vector.shape_cast %122 : vector<2x8x8xf32> to vector<16x8xf32>
    %124 = arith.truncf %123 : vector<16x8xf32> to vector<16x8xbf16>
    %125 = vector.extract_strided_slice %42 {offsets = [24, 0], sizes = [8, 32], strides = [1, 1]} : vector<32x32xbf16> to vector<8x32xbf16>
    %cst_43 = arith.constant dense<0.000000e+00> : vector<16x32xf32>
    %126 = tpu.matmul %124, %125, %cst_43 {dimension_numbers = #tpu.dot_dimension_numbers<[1], [0], [0], [1], [0, 0, 1, 1], [], []>} : vector<16x8xbf16>, vector<8x32xbf16>, vector<16x32xf32> -> vector<16x32xf32>
    %127 = arith.addf %106, %126 : vector<16x32xf32>
    %128 = arith.addf %4, %127 : vector<16x32xf32>
    %c0_44 = arith.constant 0 : index
    %c0_45 = arith.constant 0 : index
    %c0_46 = arith.constant 0 : index
    %129 = vector.load %arg7[%c0_44, %c0_45, %c0_46] : memref<1x1x32xf32, #tpu.memory_space<vmem>>, vector<1x1x32xf32>
    %130 = vector.shape_cast %129 : vector<1x1x32xf32> to vector<1x32xf32>
    %131 = vector.broadcast %130 : vector<1x32xf32> to vector<16x32xf32>
    %132 = arith.addf %128, %131 : vector<16x32xf32>
    %c0_47 = arith.constant 0 : index
    %c0_48 = arith.constant 0 : index
    %c0_49 = arith.constant 0 : index
    %133 = vector.load %arg8[%c0_47, %c0_48, %c0_49] : memref<1x1x32xf32, #tpu.memory_space<vmem>>, vector<1x1x32xf32>
    %134 = vector.shape_cast %133 : vector<1x1x32xf32> to vector<1x32xf32>
    %c0_50 = arith.constant 0 : index
    %c0_51 = arith.constant 0 : index
    %c0_52 = arith.constant 0 : index
    %135 = vector.load %arg9[%c0_50, %c0_51, %c0_52] : memref<1x1x32xf32, #tpu.memory_space<vmem>>, vector<1x1x32xf32>
    %136 = vector.shape_cast %135 : vector<1x1x32xf32> to vector<1x32xf32>
    %cst_53 = arith.constant dense<0.000000e+00> : vector<16xf32>
    %137 = vector.multi_reduction <add>, %132, %cst_53 [1] : vector<16x32xf32> to vector<16xf32>
    %138 = vector.shape_cast %137 : vector<16xf32> to vector<16x1xf32>
    %cst_54 = arith.constant 3.200000e+01 : f32
    %139 = vector.broadcast %cst_54 : f32 to vector<16x1xf32>
    %140 = arith.divf %138, %139 : vector<16x1xf32>
    %141 = vector.broadcast %140 : vector<16x1xf32> to vector<16x32xf32>
    %142 = arith.subf %132, %141 : vector<16x32xf32>
    %143 = arith.mulf %142, %142 : vector<16x32xf32>
    %cst_55 = arith.constant dense<0.000000e+00> : vector<16xf32>
    %144 = vector.multi_reduction <add>, %143, %cst_55 [1] : vector<16x32xf32> to vector<16xf32>
    %145 = vector.shape_cast %144 : vector<16xf32> to vector<16x1xf32>
    %cst_56 = arith.constant 3.200000e+01 : f32
    %146 = vector.broadcast %cst_56 : f32 to vector<16x1xf32>
    %147 = arith.divf %145, %146 : vector<16x1xf32>
    %148 = vector.broadcast %140 : vector<16x1xf32> to vector<16x32xf32>
    %149 = arith.subf %132, %148 : vector<16x32xf32>
    %cst_57 = arith.constant 9.99999974E-6 : f32
    %150 = vector.broadcast %cst_57 : f32 to vector<16x1xf32>
    %151 = arith.addf %147, %150 : vector<16x1xf32>
    %152 = math.rsqrt %151 : vector<16x1xf32>
    %153 = vector.broadcast %152 : vector<16x1xf32> to vector<16x32xf32>
    %154 = arith.mulf %149, %153 : vector<16x32xf32>
    %155 = vector.broadcast %134 : vector<1x32xf32> to vector<16x32xf32>
    %156 = arith.mulf %154, %155 : vector<16x32xf32>
    %157 = vector.broadcast %136 : vector<1x32xf32> to vector<16x32xf32>
    %158 = arith.addf %156, %157 : vector<16x32xf32>
    %159 = arith.truncf %158 : vector<16x32xf32> to vector<16x32xbf16>
    %c0_58 = arith.constant 0 : index
    %c0_59 = arith.constant 0 : index
    %c0_60 = arith.constant 0 : index
    %160 = vector.load %arg10[%c0_58, %c0_59, %c0_60] : memref<1x32x128xbf16, #tpu.memory_space<vmem>>, vector<1x32x128xbf16>
    %161 = vector.shape_cast %160 : vector<1x32x128xbf16> to vector<32x128xbf16>
    %cst_61 = arith.constant dense<0.000000e+00> : vector<16x128xf32>
    %162 = tpu.matmul %159, %161, %cst_61 {dimension_numbers = #tpu.dot_dimension_numbers<[1], [0], [0], [1], [0, 0, 1, 1], [], []>} : vector<16x32xbf16>, vector<32x128xbf16>, vector<16x128xf32> -> vector<16x128xf32>
    %c0_62 = arith.constant 0 : index
    %c0_63 = arith.constant 0 : index
    %c0_64 = arith.constant 0 : index
    %163 = vector.load %arg11[%c0_62, %c0_63, %c0_64] : memref<1x1x128xf32, #tpu.memory_space<vmem>>, vector<1x1x128xf32>
    %164 = vector.shape_cast %163 : vector<1x1x128xf32> to vector<1x128xf32>
    %165 = vector.broadcast %164 : vector<1x128xf32> to vector<16x128xf32>
    %166 = arith.addf %162, %165 : vector<16x128xf32>
    %cst_65 = arith.constant 1.702000e+00 : f32
    %167 = vector.broadcast %cst_65 : f32 to vector<16x128xf32>
    %168 = arith.mulf %167, %166 : vector<16x128xf32>
    %169 = arith.negf %168 : vector<16x128xf32>
    %170 = math.exp %169 : vector<16x128xf32>
    %cst_66 = arith.constant 1.000000e+00 : f32
    %171 = vector.broadcast %cst_66 : f32 to vector<16x128xf32>
    %172 = arith.addf %171, %170 : vector<16x128xf32>
    %173 = arith.divf %171, %172 : vector<16x128xf32>
    %174 = arith.mulf %166, %173 : vector<16x128xf32>
    %175 = arith.truncf %174 : vector<16x128xf32> to vector<16x128xbf16>
    %c0_67 = arith.constant 0 : index
    %c0_68 = arith.constant 0 : index
    %c0_69 = arith.constant 0 : index
    %176 = vector.load %arg12[%c0_67, %c0_68, %c0_69] : memref<1x128x32xbf16, #tpu.memory_space<vmem>>, vector<1x128x32xbf16>
    %177 = vector.shape_cast %176 : vector<1x128x32xbf16> to vector<128x32xbf16>
    %cst_70 = arith.constant dense<0.000000e+00> : vector<16x32xf32>
    %178 = tpu.matmul %175, %177, %cst_70 {dimension_numbers = #tpu.dot_dimension_numbers<[1], [0], [0], [1], [0, 0, 1, 1], [], []>} : vector<16x128xbf16>, vector<128x32xbf16>, vector<16x32xf32> -> vector<16x32xf32>
    %c0_71 = arith.constant 0 : index
    %c0_72 = arith.constant 0 : index
    %c0_73 = arith.constant 0 : index
    %179 = vector.load %arg13[%c0_71, %c0_72, %c0_73] : memref<1x1x32xf32, #tpu.memory_space<vmem>>, vector<1x1x32xf32>
    %180 = vector.shape_cast %179 : vector<1x1x32xf32> to vector<1x32xf32>
    %181 = vector.broadcast %180 : vector<1x32xf32> to vector<16x32xf32>
    %182 = arith.addf %178, %181 : vector<16x32xf32>
    %183 = arith.addf %132, %182 : vector<16x32xf32>
    %184 = vector.shape_cast %183 : vector<16x32xf32> to vector<2x8x32xf32>
    %c0_74 = arith.constant 0 : index
    %c0_75 = arith.constant 0 : index
    %c0_76 = arith.constant 0 : index
    %185 = vector.load %arg15[%c0_74, %c0_75, %c0_76] : memref<2x8x32xf32, #tpu.memory_space<vmem>>, vector<2x8x32xf32>
    tpu.vector_store %arg15[%c0_74, %c0_75, %c0_76], %184 {strides = array<i32>} : memref<2x8x32xf32, #tpu.memory_space<vmem>>, vector<2x8x32xf32>,
    %c1_i32 = arith.constant 1 : i32
    %186 = arith.cmpi eq, %arg0, %c1_i32 : i32
    %187 = arith.extui %186 : i1 to i32
    %c0_i32_77 = arith.constant 0 : i32
    %188 = arith.cmpi ne, %187, %c0_i32_77 : i32
    scf.if %188 {
      %189 = vector.shape_cast %183 : vector<16x32xf32> to vector<2x8x32xf32>
      %c0_78 = arith.constant 0 : index
      %c0_79 = arith.constant 0 : index
      %c0_80 = arith.constant 0 : index
      %190 = vector.load %arg14[%c0_78, %c0_79, %c0_80] : memref<2x8x32xf32, #tpu.memory_space<vmem>>, vector<2x8x32xf32>
      tpu.vector_store %arg14[%c0_78, %c0_79, %c0_80], %189 {strides = array<i32>} : memref<2x8x32xf32, #tpu.memory_space<vmem>>, vector<2x8x32xf32>,
    } else {
    }
    return
  }
  func.func @transform_0(%arg0: i32) -> (i32, i32, i32) {
    %c0_i32 = arith.constant 0 : i32
    %c0_i32_0 = arith.constant 0 : i32
    %c0_i32_1 = arith.constant 0 : i32
    %c0_i32_2 = arith.constant 0 : i32
    return %c0_i32, %c0_i32_0, %c0_i32_1 : i32, i32, i32
  }
  func.func @transform_1(%arg0: i32) -> (i32, i32, i32) {
    %c0_i32 = arith.constant 0 : i32
    %c0_i32_0 = arith.constant 0 : i32
    %c0_i32_1 = arith.constant 0 : i32
    return %arg0, %c0_i32, %c0_i32_0 : i32, i32, i32
  }
  func.func @transform_2(%arg0: i32) -> (i32, i32, i32) {
    %c0_i32 = arith.constant 0 : i32
    %c0_i32_0 = arith.constant 0 : i32
    %c0_i32_1 = arith.constant 0 : i32
    return %arg0, %c0_i32, %c0_i32_0 : i32, i32, i32
  }
  func.func @transform_3(%arg0: i32) -> (i32, i32, i32) {
    %c0_i32 = arith.constant 0 : i32
    %c0_i32_0 = arith.constant 0 : i32
    %c0_i32_1 = arith.constant 0 : i32
    return %arg0, %c0_i32, %c0_i32_0 : i32, i32, i32
  }
  func.func @transform_4(%arg0: i32) -> (i32, i32, i32) {
    %c0_i32 = arith.constant 0 : i32
    %c0_i32_0 = arith.constant 0 : i32
    %c0_i32_1 = arith.constant 0 : i32
    return %arg0, %c0_i32, %c0_i32_0 : i32, i32, i32
  }
  func.func @transform_5(%arg0: i32) -> (i32, i32, i32) {
    %c0_i32 = arith.constant 0 : i32
    %c0_i32_0 = arith.constant 0 : i32
    %c0_i32_1 = arith.constant 0 : i32
    return %arg0, %c0_i32, %c0_i32_0 : i32, i32, i32
  }
  func.func @transform_6(%arg0: i32) -> (i32, i32, i32) {
    %c0_i32 = arith.constant 0 : i32
    %c0_i32_0 = arith.constant 0 : i32
    %c0_i32_1 = arith.constant 0 : i32
    return %arg0, %c0_i32, %c0_i32_0 : i32, i32, i32
  }
  func.func @transform_7(%arg0: i32) -> (i32, i32, i32) {
    %c0_i32 = arith.constant 0 : i32
    %c0_i32_0 = arith.constant 0 : i32
    %c0_i32_1 = arith.constant 0 : i32
    return %arg0, %c0_i32, %c0_i32_0 : i32, i32, i32
  }
  func.func @transform_8(%arg0: i32) -> (i32, i32, i32) {
    %c0_i32 = arith.constant 0 : i32
    %c0_i32_0 = arith.constant 0 : i32
    %c0_i32_1 = arith.constant 0 : i32
    return %arg0, %c0_i32, %c0_i32_0 : i32, i32, i32
  }
  func.func @transform_9(%arg0: i32) -> (i32, i32, i32) {
    %c0_i32 = arith.constant 0 : i32
    %c0_i32_0 = arith.constant 0 : i32
    %c0_i32_1 = arith.constant 0 : i32
    return %arg0, %c0_i32, %c0_i32_0 : i32, i32, i32
  }
  func.func @transform_10(%arg0: i32) -> (i32, i32, i32) {
    %c0_i32 = arith.constant 0 : i32
    %c0_i32_0 = arith.constant 0 : i32
    %c0_i32_1 = arith.constant 0 : i32
    return %arg0, %c0_i32, %c0_i32_0 : i32, i32, i32
  }
  func.func @transform_11(%arg0: i32) -> (i32, i32, i32) {
    %c0_i32 = arith.constant 0 : i32
    %c0_i32_0 = arith.constant 0 : i32
    %c0_i32_1 = arith.constant 0 : i32
    return %arg0, %c0_i32, %c0_i32_0 : i32, i32, i32
  }
  func.func @transform_12(%arg0: i32) -> (i32, i32, i32) {
    %c0_i32 = arith.constant 0 : i32
    %c0_i32_0 = arith.constant 0 : i32
    %c0_i32_1 = arith.constant 0 : i32
    return %arg0, %c0_i32, %c0_i32_0 : i32, i32, i32
  }
  func.func @transform_13(%arg0: i32) -> (i32, i32, i32) {
    %c0_i32 = arith.constant 0 : i32
    %c0_i32_0 = arith.constant 0 : i32
    %c0_i32_1 = arith.constant 0 : i32
    %c0_i32_2 = arith.constant 0 : i32
    return %c0_i32, %c0_i32_0, %c0_i32_1 : i32, i32, i32
  }
}

</mosaic_0001>

<bundles_post_ra>
// kernel: tpu_custom_call.1
= control target key start
LH: loop header
LB: loop body
LE: loop exit
PB: predicated region body
PF: predicated region fallthrough
CT: control target
= control target key end

     0   :  { %s2249_s0 = inlined_call_operand.vmem [shape: f32[2,8,32], index: 0, kind: input, shape index: {}]   ;;  %s2250_s1 = inlined_call_operand.vmem [shape: f32[2,1,32], index: 1, kind: input, shape index: {}]   ;;  %s2251_s2 = inlined_call_operand.vmem [shape: f32[2,1,32], index: 2, kind: input, shape index: {}]   ;;  %s2252_s3 = inlined_call_operand.vmem [shape: bf16[2,32,96], index: 3, kind: input, shape index: {}]   ;;  %s2253_s4 = inlined_call_operand.vmem [shape: f32[2,1,96], index: 4, kind: input, shape index: {}]   ;;  %s2254_s5 = inlined_call_operand.vmem [shape: bf16[2,32,32], index: 5, kind: input, shape index: {}]   ;;  %s2255_s6 = inlined_call_operand.vmem [shape: f32[2,1,32], index: 6, kind: input, shape index: {}]   ;;  %s2256_s7 = inlined_call_operand.vmem [shape: f32[2,1,32], index: 7, kind: input, shape index: {}]   ;;  %s2257_s8 = inlined_call_operand.vmem [shape: f32[2,1,32], index: 8, kind: input, shape index: {}]   ;;  %s2258_s9 = inlined_call_operand.vmem [shape: bf16[2,32,128], index: 9, kind: input, shape index: {}]   ;;  %s2259_s10 = inlined_call_operand.vmem [shape: f32[2,1,128], index: 10, kind: input, shape index: {}]   ;;  %s2260_s11 = inlined_call_operand.vmem [shape: bf16[2,128,32], index: 11, kind: input, shape index: {}]   ;;  %s2261_s12 = inlined_call_operand.vmem [shape: f32[2,1,32], index: 12, kind: input, shape index: {}]   ;;  %s2262_s13 = inlined_call_operand.hbm [shape: f32[2,8,32], index: 13, kind: output, shape index: {}]  }
   0x1   :  { %2265 = sst [smem:[#allocation8_spill]] %s2252_s3 }
   0x2   :  { %2266 = sst [smem:[#allocation9_spill]] %s2254_s5 }
   0x3   :  { %2267 = sst [smem:[#allocation10_spill]] %s2262_s13 }
   0x4   :  { %18 = vsyncpa [#allocation4], 0  ;;  %s1972_s25 = smov 0  }
   0x5 LB: > { %2268 = sst [smem:[#allocation6_spill]] %s1885_s25  ;;  %s1978_s26 = sadd.s32 4294967295, %s1885_s25   ;;  %s1885_s25 = sphi %s1972_s25, %s24_s25  }
   0x6   : > { %p1657_p0 = scmp.ge.s32.totalorder %s1885_s25, 1  ;;  %p477_p1 = scmp.lt.s32.totalorder %s1885_s25, 3 }
   0x8   : > { %p478_p2 = pnand %p1657_p0, %p477_p1 }
   0xa   : > { %481 = sbr.rel (%p478_p2) target bundleno = 2622 (0xa3e), region = 72 }
   0xf   : > { %p555_p3 = scmp.lt.s32.totalorder %s1978_s26, 1  ;;  %s2269_s3 = sld [smem:[#allocation8_spill]] }
  0x10   : > { %s2270_s5 = sld [smem:[#allocation9_spill]]  ;;  %p1666_p4 = scmp.ne.s32.totalorder %s1978_s26, 0 }
  0x11   : > { %s1984_s27 = scalar_select %p555_p3, %s1978_s26, 1 }
  0x13   : > { %s1744_s17 = sshll.u32 %s1984_s27, 4  ;;  %s579_s13 = scalar_lea.vmem %s2256_s7, %s1984_s27 }
  0x14   : > { %s582_s20 = scalar_lea.vmem %s2257_s8, %s1984_s27  ;;  %s598_s18 = scalar_lea.vmem %s2261_s12, %s1984_s27 }
  0x15   : > { %s2002_s23 = scalar_lea.vmem %s2269_s3, %s1744_s17  ;;  %s2024_s3 = scalar_lea.vmem %s2258_s9, %s1744_s17 }
  0x16   : > { %s2007_s29 = scalar_lea.vmem %s2270_s5, %s1744_s17  ;;  %s590_s5 = scalar_lea.vmem %s2259_s10, %s1984_s27 }
  0x17   : > { %2271 = sst [smem:[#allocation7_spill]] %s2007_s29  ;;  %s1747_s29 = sshll.u32 %s1984_s27, 6 }
  0x18   : > { %s2034_s14 = scalar_lea.vmem %s2260_s11, %s1747_s29  ;;  %603 = sbr.rel (%p1666_p4) target bundleno = 32 (0x20), region = 76 }
  0x1d   : > { %v604_v0 = vld [vmem:[%s2249_s0] sm:$0xff]  ;;  %vm606_vm0 = vcmask 261120   ;;  %v605_v1 = vld [vmem:[%s2249_s0 + $0x8] sm:$0xff] }
  0x1e   : > { %607 = vst.msk [vmem:[#allocation2] sm:$0xff] %vm606_vm0, %v604_v0 }
  0x1f   : > { %608 = vst.msk [vmem:[#allocation2 + $0x8] sm:$0xff] %vm606_vm0, %v605_v1 }
  0x20 PF: > { %vm613_vm1 = vcmask 261120   ;;  %v1887_v6 = vmov 32.0   ;;  %v1749_v23 = vld [vmem:[%s2002_s23 + $0x8] sm:$0xff]  ;;  %v1748_v25 = vld [vmem:[%s2002_s23] sm:$0xff]  ;;  %s2272_s24 = scalar_lea.vmem %s2250_s1, %s1984_s27  ;;  %s2273_s30 = scalar_lea.vmem %s2251_s2, %s1984_s27  ;;  %vm724_vm9 = vcmask 64512   ;;  %vm797_vm10 = vcmask 1043456  }
  0x21   : > { %1797 = vrcp.f32 %v1887_v6  ;;  %705 = vmatpush.bf16.msra.mxu0 %v1749_v23  ;;  %v1789_v44 = vld [vmem:[%s2272_s24] ss:$0 sm:$0xff]  ;;  %s2274_s19 = scalar_lea.vmem %s2253_s4, %s1984_s27  ;;  %s1888_s17 = smov 96  }
  0x22   : > { %v1790_v49 = vld [vmem:[%s2273_s30] ss:$0 sm:$0xff]  ;;  %s1889_s21 = smov 88   ;;  %s1890_s22 = smov 120  }
  0x23   : > { %v1791_v54 = vld [vmem:[%s2274_s19] ss:$0 sm:$0xff]  ;;  %s1891_s23 = smov 56   ;;  %s1892_s29 = smov 80  }
  0x24   : > { %s1893_s24 = smov 64   ;;  %s1894_s28 = smov 112  }
  0x25   : > { %v2047_v2 = vld [vmem:[#allocation2] sm:$0xff]  ;;  %706 = vmatpush.bf16.msra.mxu0 %v1748_v25  ;;  %s2275_s25 = sld [smem:[#allocation7_spill]]  ;;  %s1895_s30 = smov 48  }
  0x26   : > { %v614_v3 = vsel %vm613_vm1, %v2047_v2, 0.0  ;;  %v2051_v4 = vld [vmem:[#allocation2 + $0x8] sm:$0xff]  ;;  %s1896_s16 = smov 72   ;;  %s1897_s15 = smov 104  }
  0x27   : > { %615 = vadd.xlane.f32.xlu0 %v614_v3  ;;  %v617_v5 = vsel %vm613_vm1, %v2051_v4, 0.0  ;;  %v1798_v7 = vpop.eup %1797  ;;  %s1898_s19 = smov 40   ;;  %p1739_p5 = scmp.ne.s32.totalorder %s1978_s26, 1 }
  0x28   : > { %v621_v8 = vmul.f32 32.0, %v1798_v7  ;;  %vm625_vm2 = vweird.f32 %v1798_v7 }
  0x2a   : > { %v622_v9 = vsub.f32 1.0, %v621_v8 }
  0x2c   : > { %v623_v10 = vmul.f32 %v1798_v7, %v622_v9 }
  0x2e   : > { %v624_v11 = vadd.f32 %v1798_v7, %v623_v10 }
  0x2f   : > { %618 = vadd.xlane.f32.xlu0 %v617_v5 }
  0x30   : > { %v2055_v12 = vsel %vm625_vm2, %v1798_v7, %v624_v11 }
  0x9a   : > { %v616_v13 = vpop.xlane.xlu0 %615 }
  0x9b   : > { %v627_v14 = vmul.f32 %v2055_v12, %v616_v13 }
  0x9d   : > { %v629_v15 = vsub.f32 %v2047_v2, %v627_v14 }
  0x9f   : > { %v631_v16 = vmul.f32 %v629_v15, %v629_v15 }
  0xa1   : > { %v633_v17 = vsel %vm613_vm1, %v631_v16, 0.0 }
  0xa2   : > { %634 = vadd.xlane.f32.xlu1 %v633_v17  ;;  %v619_v18 = vpop.xlane.xlu0 %618 }
  0xa3   : > { %v628_v19 = vmul.f32 %v2055_v12, %v619_v18 }
  0xa5   : > { %v630_v20 = vsub.f32 %v2051_v4, %v628_v19 }
  0xa7   : > { %v632_v21 = vmul.f32 %v630_v20, %v630_v20 }
  0xa9   : > { %v636_v22 = vsel %vm613_vm1, %v632_v21, 0.0 }
  0xaa   : > { %637 = vadd.xlane.f32.xlu1 %v636_v22 }
 0x115   : > { %v635_v24 = vpop.xlane.xlu1 %634 }
 0x116   : > { %v639_v26 = vmul.f32 %v635_v24, %v2055_v12 }
 0x118   : > { %v641_v27 = vadd.f32 1e-05, %v639_v26 }
 0x11a   : > { %1799 = vrsqrt.f32 %v641_v27  ;;  %vm649_vm4 = vweird.f32 %v641_v27 }
 0x11d   : > { %v638_v28 = vpop.xlane.xlu1 %637 }
 0x11e   : > { %v640_v29 = vmul.f32 %v638_v28, %v2055_v12 }
 0x120   : > { %v1800_v30 = vpop.eup %1799  ;;  %v642_v31 = vadd.f32 1e-05, %v640_v29 }
 0x121   : > { %v644_v32 = vmul.f32 %v1800_v30, %v641_v27  ;;  %vm650_vm3 = vweird.f32 %v1800_v30 }
 0x122   : > { %1801 = vrsqrt.f32 %v642_v31  ;;  %vm651_vm5 = vmor %vm649_vm4, %vm650_vm3  ;;  %vm659_vm7 = vweird.f32 %v642_v31 }
 0x123   : > { %v645_v33 = vmul.f32 %v1800_v30, %v644_v32 }
 0x125   : > { %v646_v34 = vmul.f32 0.5, %v645_v33 }
 0x127   : > { %v647_v35 = vsub.f32 1.5, %v646_v34 }
 0x128   : > { %v1802_v36 = vpop.eup %1801 }
 0x129   : > { %v648_v37 = vmul.f32 %v1800_v30, %v647_v35  ;;  %v654_v38 = vmul.f32 %v1802_v36, %v642_v31  ;;  %vm660_vm6 = vweird.f32 %v1802_v36 }
 0x12a   : > { %vm661_vm8 = vmor %vm659_vm7, %vm660_vm6 }
 0x12b   : > { %v655_v39 = vmul.f32 %v1802_v36, %v654_v38  ;;  %v652_v40 = vsel %vm651_vm5, %v1800_v30, %v648_v37 }
 0x12c   : > { %v663_v43 = vmul.f32 %v652_v40, %v629_v15 }
 0x12d   : > { %v656_v41 = vmul.f32 0.5, %v655_v39 }
 0x12e   : > { %v668_v48 = vmul.f32 %v1789_v44, %v663_v43 }
 0x12f   : > { %v657_v42 = vsub.f32 1.5, %v656_v41 }
 0x130   : > { %v673_v51 = vadd.f32 %v1790_v49, %v668_v48 }
 0x131   : > { %v658_v45 = vmul.f32 %v1802_v36, %v657_v42 }
 0x133   : > { %v662_v46 = vsel %vm661_vm8, %v1802_v36, %v658_v45 }
 0x134   : > { %v664_v47 = vmul.f32 %v662_v46, %v630_v20 }
 0x136   : > { %v669_v50 = vmul.f32 %v1789_v44, %v664_v47 }
 0x138   : > { %v674_v52 = vadd.f32 %v1790_v49, %v669_v50 }
 0x13a   : > { %v675_v53 = vpack.c.bf16 %v674_v52, %v673_v51 }
 0x13c   : > { %1675 = vmatmul.msk.bf16.vlgmr.msra.gmra.mxu0 %vm613_vm1, %v675_v53 }
 0x1b9   : > { %v708_v55 = vpop.f32.mrf.mxu0 }
 0x1ba   : > { %v709_v56 = vadd.f32 %v1791_v54, %v708_v55 }
 0x1bc   : > { %v713_v57 = vpack.c.bf16 %v709_v56, %v709_v56 }
 0x1be   : > { %v720_v58 = vunpack.c.l.b16 %v713_v57 }
 0x1c0   : > { %v2083_v59 = vpack.c.b16 %v720_v58, %v720_v58 }
 0x1c1   : > { %v710_v60 = vpop.f32.mrf.mxu0 }
 0x1c2   : > { %v711_v61 = vadd.f32 %v1791_v54, %v710_v60  ;;  %722 = vrot.lane.b32.xlu0 %v2083_v59, %s1888_s17  ;;  %838 = vrot.lane.b32.xlu2 %v2083_v59, %s1889_s21  ;;  %v716_v60 = vld [vmem:[%s2275_s25 + $0x4] sm:$0xf] }
 0x1c4   : > { %v714_v62 = vpack.c.bf16 %v711_v61, %v711_v61  ;;  %v953_v61 = vsel %vm797_vm10, %v716_v60, 0 }
 0x1c6   : > { %v745_v63 = vunpack.c.l.b16 %v714_v62 }
 0x1c8   : > { %v2087_v0 = vpack.c.b16 %v745_v63, %v745_v63 }
 0x1ca   : > { %747 = vrot.lane.b32.xlu1 %v2087_v0, %s1888_s17  ;;  %836 = vrot.lane.b32.xlu2 %v2083_v59, %s1890_s22 }
 0x1d2   : > { %906 = vrot.lane.b32.xlu1 %v2083_v59, %s1891_s23  ;;  %861 = vrot.lane.b32.xlu2 %v2087_v0, %s1889_s21 }
 0x1da   : > { %859 = vrot.lane.b32.xlu2 %v2087_v0, %s1890_s22  ;;  %s2276_s22 = scalar_lea.vmem %s2255_s6, %s1984_s27 }
 0x21c   : > { %v839_v1 = vpop.permute.xlu2 %838 }
 0x21d   : > { %v844_v3 = vsel %vm724_vm9, %v839_v1, 0 }
 0x21e   : > { %853 = vmatpush.bf16.xpose.msrb.mxu0 %v844_v3 }
 0x224   : > { %v837_v5 = vpop.permute.xlu2 %836 }
 0x225   : > { %1680 = vmatmul.msk.bf16.vlgmr.msrb.gmra.mxu0 %vm724_vm9, %v837_v5 }
 0x226   : > { %962 = vmatpush.bf16.msra.mxu0 %v953_v61 }
 0x22c   : > { %v862_v6 = vpop.permute.xlu2 %861 }
 0x22d   : > { %v867_v7 = vsel %vm724_vm9, %v862_v6, 0 }
 0x22e   : > { %876 = vmatpush.bf16.xpose.msra.mxu1 %v867_v7 }
 0x234   : > { %v723_v8 = vpop.permute.xlu0 %722  ;;  %v860_v9 = vpop.permute.xlu2 %859 }
 0x235   : > { %1681 = vmatmul.msk.bf16.vlgmr.msra.gmra.mxu1 %vm724_vm9, %v860_v9  ;;  %v729_v10 = vsel %vm724_vm9, %v723_v8, 0 }
 0x236   : > { %738 = vmatpush.bf16.xpose.msra.mxu2 %v729_v10 }
 0x23c   : > { %v748_v11 = vpop.permute.xlu1 %747 }
 0x23d   : > { %1676 = vmatmul.msk.bf16.vlgmr.msra.gmra.mxu2 %vm724_vm9, %v713_v57  ;;  %v753_v13 = vsel %vm724_vm9, %v748_v11, 0 }
 0x23e   : > { %762 = vmatpush.bf16.xpose.msrb.mxu2 %v753_v13 }
 0x244   : > { %v907_v14 = vpop.permute.xlu1 %906 }
 0x245   : > { %v912_v15 = vsel %vm797_vm10, %v907_v14, 0 }
 0x246   : > { %921 = vmatpush.bf16.msra.mxu2 %v912_v15 }
 0x24d   : > { %1677 = vmatmul.msk.bf16.vlgmr.msrb.gmra.mxu2 %vm724_vm9, %v714_v62 }
 0x2a2   : > { %v855_v16 = vpop.f32.mrf.mxu0 }
 0x2a3   : > { %v882_v17 = vsel %vm724_vm9, %v855_v16, -inf }
 0x2a4   : > { %883 = vmax.xlane.f32.xlu2 %v882_v17 }
 0x2aa   : > { %v857_v18 = vpop.f32.mrf.mxu0 }
 0x2b2   : > { %v878_v19 = vpop.f32.mrf.mxu1 }
 0x2b3   : > { %v885_v27 = vsel %vm724_vm9, %v878_v19, -inf }
 0x2ba   : > { %v880_v20 = vpop.f32.mrf.mxu1 }
 0x2bc   : > { %991 = vrot.lane.b32.xlu2 %v2083_v59, %s1892_s29 }
 0x2c0   : > { %v740_v21 = vpop.f32.mrf.mxu2 }
 0x2c1   : > { %v768_v22 = vsel %vm724_vm9, %v740_v21, -inf }
 0x2c2   : > { %769 = vmax.xlane.f32.xlu1 %v768_v22 }
 0x2c8   : > { %v742_v23 = vpop.f32.mrf.mxu2 }
 0x2d0   : > { %v764_v24 = vpop.f32.mrf.mxu2 }
 0x2d1   : > { %v771_v25 = vsel %vm724_vm9, %v764_v24, -inf }
 0x2d2   : > { %772 = vmax.xlane.f32.xlu1 %v771_v25 }
 0x2d8   : > { %v766_v26 = vpop.f32.mrf.mxu2 }
 0x2e5   : > { %886 = vmax.xlane.f32.xlu2 %v885_v27 }
 0x2eb   : > { %792 = vrot.lane.b32.xlu1 %v2083_v59, %s1893_s24 }
 0x2fd   : > { %814 = vrot.lane.b32.xlu2 %v2087_v0, %s1893_s24 }
 0x305   : > { %1014 = vrot.lane.b32.xlu2 %v2087_v0, %s1892_s29 }
 0x317   : > { %v884_v28 = vpop.xlane.xlu2 %883 }
 0x318   : > { %v888_v29 = vsub.f32 %v855_v16, %v884_v28  ;;  %v715_v28 = vld [vmem:[%s2275_s25] sm:$0xf] }
 0x31a   : > { %v890_v30 = vmul.f32 1.442695, %v888_v29  ;;  %v973_v29 = vsel %vm797_vm10, %v715_v28, 0 }
 0x31b   : > { %982 = vmatpush.bf16.msrb.mxu1 %v973_v29 }
 0x31c   : > { %1803 = vpow2.f32 %v890_v30 }
 0x31f   : > { %v992_v31 = vpop.permute.xlu2 %991 }
 0x320   : > { %v997_v32 = vsel %vm724_vm9, %v992_v31, 0 }
 0x321   : > { %1006 = vmatpush.bf16.xpose.msrb.mxu2 %v997_v32 }
 0x322   : > { %v1804_v33 = vpop.eup %1803 }
 0x323   : > { %v894_v34 = vsel %vm724_vm9, %v1804_v33, 0.0 }
 0x324   : > { %895 = vadd.xlane.f32.xlu0 %v894_v34 }
 0x335   : > { %v770_v35 = vpop.xlane.xlu1 %769 }
 0x336   : > { %v774_v40 = vsub.f32 %v740_v21, %v770_v35 }
 0x338   : > { %989 = vrot.lane.b32.xlu0 %v2083_v59, %s1894_s28  ;;  %v776_v42 = vmul.f32 1.442695, %v774_v40 }
 0x345   : > { %v773_v36 = vpop.xlane.xlu1 %772 }
 0x346   : > { %v775_v37 = vsub.f32 %v764_v24, %v773_v36 }
 0x348   : > { %v778_v38 = vmul.f32 1.442695, %v775_v37 }
 0x34a   : > { %1805 = vpow2.f32 %v778_v38 }
 0x34b   : > { %1807 = vpow2.f32 %v776_v42 }
 0x350   : > { %v1806_v39 = vpop.eup %1805 }
 0x351   : > { %v783_v41 = vsel %vm724_vm9, %v1806_v39, 0.0  ;;  %v1808_v47 = vpop.eup %1807 }
 0x352   : > { %784 = vadd.xlane.f32.xlu1 %v783_v41  ;;  %v780_v50 = vsel %vm724_vm9, %v1808_v47, 0.0 }
 0x358   : > { %v887_v43 = vpop.xlane.xlu2 %886 }
 0x359   : > { %v889_v44 = vsub.f32 %v878_v19, %v887_v43 }
 0x35b   : > { %v892_v45 = vmul.f32 1.442695, %v889_v44 }
 0x35d   : > { %v793_v46 = vpop.permute.xlu1 %792  ;;  %1809 = vpow2.f32 %v892_v45 }
 0x35e   : > { %v799_v48 = vsel %vm797_vm10, %v793_v46, 0 }
 0x35f   : > { %808 = vmatpush.bf16.msra.mxu3 %v799_v48 }
 0x360   : > { %v815_v49 = vpop.permute.xlu2 %814 }
 0x361   : > { %v820_v51 = vsel %vm797_vm10, %v815_v49, 0 }
 0x362   : > { %781 = vadd.xlane.f32.xlu0 %v780_v50 }
 0x363   : > { %829 = vmatpush.bf16.msrb.mxu3 %v820_v51  ;;  %v1810_v52 = vpop.eup %1809 }
 0x364   : > { %v897_v53 = vsel %vm724_vm9, %v1810_v52, 0.0 }
 0x368   : > { %v1015_v13 = vpop.permute.xlu2 %1014 }
 0x369   : > { %v1020_v17 = vsel %vm724_vm9, %v1015_v13, 0 }
 0x36a   : > { %898 = vadd.xlane.f32.xlu0 %v897_v53 }
 0x36b   : > { %1012 = vrot.lane.b32.xlu1 %v2087_v0, %s1894_s28 }
 0x373   : > { %1059 = vrot.lane.b32.xlu1 %v2083_v59, %s1895_s30 }
 0x37b   : > { %1126 = vrot.lane.b32.xlu1 %v2083_v59, %s1896_s16 }
 0x37e   : > { %927 = vrot.lane.b32.xlu0 %v2087_v0, %s1891_s23 }
 0x383   : > { %1149 = vrot.lane.b32.xlu1 %v2087_v0, %s1896_s16 }
 0x397   : > { %v896_v54 = vpop.xlane.xlu0 %895 }
 0x398   : > { %1811 = vrcp.f32 %v896_v54 }
 0x39e   : > { %v1812_v55 = vpop.eup %1811 }
 0x39f   : > { %v902_v56 = vmul.f32 %v1812_v55, %v1804_v33 }
 0x3a1   : > { %v904_v57 = vpack.c.bf16 %v902_v56, %v902_v56 }
 0x3a3   : > { %1682 = vmatmul.msk.bf16.vlgmr.msra.gmra.mxu2 %vm724_vm9, %v904_v57 }
 0x3aa   : > { %v990_v58 = vpop.permute.xlu0 %989 }
 0x3b3   : > { %1686 = vmatmul.msk.bf16.vlgmr.msrb.gmra.mxu2 %vm724_vm9, %v990_v58 }
 0x3c5   : > { %v785_v62 = vpop.xlane.xlu1 %784 }
 0x3d5   : > { %v782_v63 = vpop.xlane.xlu0 %781 }
 0x3d6   : > { %1813 = vrcp.f32 %v782_v63 }
 0x3d7   : > { %1815 = vrcp.f32 %v785_v62 }
 0x3dc   : > { %v1814_v1 = vpop.eup %1813 }
 0x3dd   : > { %v1013_v3 = vpop.permute.xlu1 %1012  ;;  %v788_v5 = vmul.f32 %v1814_v1, %v1808_v47  ;;  %v1816_v9 = vpop.eup %1815 }
 0x3de   : > { %v899_v10 = vpop.xlane.xlu0 %898  ;;  %v789_v11 = vmul.f32 %v1816_v9, %v1806_v39 }
 0x3df   : > { %v790_v6 = vpack.c.bf16 %v788_v5, %v788_v5  ;;  %1817 = vrcp.f32 %v899_v10 }
 0x3e0   : > { %v791_v14 = vpack.c.bf16 %v789_v11, %v789_v11 }
 0x3e1   : > { %1678 = vmatmul.msk.bf16.vlgmr.msra.gmra.mxu3 %vm724_vm9, %v790_v6 }
 0x3e5   : > { %v1060_v7 = vpop.permute.xlu1 %1059  ;;  %v1818_v18 = vpop.eup %1817 }
 0x3e6   : > { %v1065_v8 = vsel %vm797_vm10, %v1060_v7, 0  ;;  %v903_v19 = vmul.f32 %v1818_v18, %v1810_v52 }
 0x3e7   : > { %1074 = vmatpush.bf16.msrb.mxu0 %v1065_v8 }
 0x3e8   : > { %v905_v21 = vpack.c.bf16 %v903_v19, %v903_v19 }
 0x3ed   : > { %v1127_v20 = vpop.permute.xlu1 %1126 }
 0x3ee   : > { %v1132_v22 = vsel %vm724_vm9, %v1127_v20, 0 }
 0x3f0   : > { %v928_v15 = vpop.permute.xlu0 %927 }
 0x3f1   : > { %v933_v16 = vsel %vm797_vm10, %v928_v15, 0  ;;  %1679 = vmatmul.msk.bf16.vlgmr.msrb.gmra.mxu3 %vm724_vm9, %v791_v14 }
 0x3f2   : > { %942 = vmatpush.bf16.msra.mxu3 %v933_v16 }
 0x3f5   : > { %v1150_v35 = vpop.permute.xlu1 %1149 }
 0x3f6   : > { %1029 = vmatpush.bf16.xpose.msrb.mxu3 %v1020_v17  ;;  %v1155_v38 = vsel %vm724_vm9, %v1150_v35, 0 }
 0x401   : > { %1683 = vmatmul.msk.bf16.vlgmr.msra.gmra.mxu3 %vm724_vm9, %v905_v21 }
 0x402   : > { %1141 = vmatpush.bf16.xpose.msra.mxu3 %v1132_v22 }
 0x411   : > { %1687 = vmatmul.msk.bf16.vlgmr.msrb.gmra.mxu3 %vm724_vm9, %v1013_v3 }
 0x426   : > { %v923_v23 = vpop.f32.mrf.mxu2 }
 0x42e   : > { %v925_v24 = vpop.f32.mrf.mxu2 }
 0x436   : > { %v1008_v25 = vpop.f32.mrf.mxu2 }
 0x437   : > { %v1035_v26 = vsel %vm724_vm9, %v1008_v25, -inf }
 0x438   : > { %1036 = vmax.xlane.f32.xlu0 %v1035_v26 }
 0x43e   : > { %v1010_v27 = vpop.f32.mrf.mxu2 }
 0x44c   : > { %1124 = vrot.lane.b32.xlu0 %v2083_v59, %s1897_s15 }
 0x464   : > { %v810_v30 = vpop.f32.mrf.mxu3 }
 0x46c   : > { %v812_v31 = vpop.f32.mrf.mxu3 }
 0x474   : > { %v831_v32 = vpop.f32.mrf.mxu3 }
 0x475   : > { %v835_v33 = vpack.c.bf16 %v831_v32, %v810_v30 }
 0x477   : > { %1685 = vmatmul.msk.bf16.vlgmr.msrb.gmra.mxu1 %vm724_vm9, %v835_v33 }
 0x47c   : > { %v833_v34 = vpop.f32.mrf.mxu3 }
 0x484   : > { %v944_v36 = vpop.f32.mrf.mxu3 }
 0x485   : > { %v948_v37 = vpack.c.bf16 %v944_v36, %v923_v23  ;;  %v717_v23 = vld [vmem:[%s2275_s25 + $0x8] sm:$0xf] }
 0x486   : > { %v1106_v24 = vsel %vm797_vm10, %v717_v23, 0 }
 0x487   : > { %1684 = vmatmul.msk.bf16.vlgmr.msra.gmra.mxu0 %vm724_vm9, %v948_v37  ;;  %1115 = vmatpush.bf16.msra.mxu2 %v1106_v24 }
 0x488   : > { %1164 = vmatpush.bf16.xpose.msra.mxu0 %v1155_v38 }
 0x48c   : > { %v946_v39 = vpop.f32.mrf.mxu3 }
 0x494   : > { %v1031_v40 = vpop.f32.mrf.mxu3 }
 0x495   : > { %v1038_v41 = vsel %vm724_vm9, %v1031_v40, -inf }
 0x496   : > { %1039 = vmax.xlane.f32.xlu1 %v1038_v41 }
 0x49c   : > { %v1033_v42 = vpop.f32.mrf.mxu3 }
 0x4ab   : > { %v1037_v43 = vpop.xlane.xlu0 %1036 }
 0x4ac   : > { %v1041_v44 = vsub.f32 %v1008_v25, %v1037_v43 }
 0x4ae   : > { %v1043_v45 = vmul.f32 1.442695, %v1041_v44 }
 0x4b0   : > { %1819 = vpow2.f32 %v1043_v45 }
 0x4b6   : > { %v1820_v46 = vpop.eup %1819 }
 0x4b7   : > { %v1047_v47 = vsel %vm724_vm9, %v1820_v46, 0.0 }
 0x4b8   : > { %1048 = vadd.xlane.f32.xlu2 %v1047_v47 }
 0x4be   : > { %v1125_v48 = vpop.permute.xlu0 %1124 }
 0x4bf   : > { %1691 = vmatmul.msk.bf16.vlgmr.msra.gmra.mxu3 %vm724_vm9, %v1125_v48 }
 0x4d0   : > { %1147 = vrot.lane.b32.xlu2 %v2087_v0, %s1897_s15 }
 0x4d8   : > { %1080 = vrot.lane.b32.xlu2 %v2087_v0, %s1895_s30 }
 0x4f4   : > { %v984_v49 = vpop.f32.mrf.mxu1 }
 0x4fc   : > { %v986_v25 = vpop.f32.mrf.mxu1 }
 0x504   : > { %v964_v50 = vpop.f32.mrf.mxu0 }
 0x505   : > { %v2154_v51 = vadd.f32 %v984_v49, %v964_v50  ;;  %v718_v49 = vld [vmem:[%s2275_s25 + $0xc] sm:$0xf] }
 0x509   : > { %v1040_v52 = vpop.xlane.xlu1 %1039 }
 0x50a   : > { %v1042_v53 = vsub.f32 %v1031_v40, %v1040_v52 }
 0x50c   : > { %v1045_v54 = vmul.f32 1.442695, %v1042_v53  ;;  %v2162_v11 = vpop.f32.mrf.mxu0 }
 0x50e   : > { %1821 = vpow2.f32 %v1045_v54 }
 0x514   : > { %v1822_v55 = vpop.eup %1821 }
 0x515   : > { %v1050_v56 = vsel %vm724_vm9, %v1822_v55, 0.0 }
 0x516   : > { %1051 = vadd.xlane.f32.xlu0 %v1050_v56  ;;  %v1792_v56 = vld [vmem:[%s2276_s22] ss:$0 sm:$0xff] }
 0x52b   : > { %v1049_v57 = vpop.xlane.xlu2 %1048 }
 0x52c   : > { %1823 = vrcp.f32 %v1049_v57 }
 0x532   : > { %v1824_v58 = vpop.eup %1823 }
 0x533   : > { %v1055_v60 = vmul.f32 %v1824_v58, %v1820_v46  ;;  %v1148_v61 = vpop.permute.xlu2 %1147  ;;  %v987_v58 = vadd.f32 %v986_v25, %v2162_v11 }
 0x535   : > { %v1057_v62 = vpack.c.bf16 %v1055_v60, %v1055_v60 }
 0x537   : > { %1688 = vmatmul.msk.bf16.vlgmr.msrb.gmra.mxu0 %vm724_vm9, %v1057_v62 }
 0x53b   : > { %v1081_v63 = vpop.permute.xlu2 %1080 }
 0x53c   : > { %v1086_v1 = vsel %vm797_vm10, %v1081_v63, 0 }
 0x53d   : > { %1095 = vmatpush.bf16.msra.mxu1 %v1086_v1 }
 0x542   : > { %v1143_v3 = vpop.f32.mrf.mxu3 }
 0x543   : > { %v1170_v5 = vsel %vm724_vm9, %v1143_v3, -inf }
 0x544   : > { %1171 = vmax.xlane.f32.xlu1 %v1170_v5 }
 0x547   : > { %1692 = vmatmul.msk.bf16.vlgmr.msra.gmra.mxu0 %vm724_vm9, %v1148_v61 }
 0x54a   : > { %v1145_v6 = vpop.f32.mrf.mxu3 }
 0x589   : > { %v1052_v7 = vpop.xlane.xlu0 %1051 }
 0x58a   : > { %1825 = vrcp.f32 %v1052_v7 }
 0x590   : > { %v1826_v8 = vpop.eup %1825 }
 0x591   : > { %v1056_v9 = vmul.f32 %v1826_v8, %v1822_v55 }
 0x593   : > { %v1058_v10 = vpack.c.bf16 %v1056_v9, %v1056_v9 }
 0x595   : > { %1689 = vmatmul.msk.bf16.vlgmr.msra.gmra.mxu1 %vm724_vm9, %v1058_v10 }
 0x5b4   : > { %v1076_v13 = vpop.f32.mrf.mxu0 }
 0x5b7   : > { %v1172_v14 = vpop.xlane.xlu1 %1171 }
 0x5b8   : > { %v1176_v15 = vsub.f32 %v1143_v3, %v1172_v14 }
 0x5ba   : > { %v1178_v16 = vmul.f32 1.442695, %v1176_v15 }
 0x5bc   : > { %1827 = vpow2.f32 %v1178_v16  ;;  %v1078_v17 = vpop.f32.mrf.mxu0  ;;  %v1751_v16 = vld [vmem:[%s2024_s3 + $0x8] sm:$0xff] }
 0x5bd   : > { %1353 = vmatpush.bf16.msrb.mxu0 %v1751_v16 }
 0x5c2   : > { %v1828_v18 = vpop.eup %1827 }
 0x5c3   : > { %v1182_v19 = vsel %vm724_vm9, %v1828_v18, 0.0 }
 0x5c4   : > { %1183 = vadd.xlane.f32.xlu0 %v1182_v19  ;;  %v1166_v20 = vpop.f32.mrf.mxu0 }
 0x5c5   : > { %v1173_v21 = vsel %vm724_vm9, %v1166_v20, -inf }
 0x5c6   : > { %1174 = vmax.xlane.f32.xlu2 %v1173_v21 }
 0x5cc   : > { %v1168_v22 = vpop.f32.mrf.mxu0 }
 0x5d8   : > { %1194 = vrot.lane.b32.xlu0 %v2083_v59, %s1898_s19 }
 0x612   : > { %v1097_v26 = vpop.f32.mrf.mxu1 }
 0x613   : > { %v1101_v27 = vpack.c.bf16 %v1097_v26, %v1076_v13 }
 0x615   : > { %1690 = vmatmul.msk.bf16.vlgmr.msra.gmra.mxu2 %vm724_vm9, %v1101_v27 }
 0x61a   : > { %v1099_v28 = vpop.f32.mrf.mxu1 }
 0x637   : > { %v1184_v32 = vpop.xlane.xlu0 %1183 }
 0x639   : > { %v1175_v29 = vpop.xlane.xlu2 %1174 }
 0x63a   : > { %v1177_v30 = vsub.f32 %v1166_v20, %v1175_v29  ;;  %v1750_v20 = vld [vmem:[%s2024_s3] sm:$0xff] }
 0x63b   : > { %1354 = vmatpush.bf16.msrb.mxu0 %v1750_v20 }
 0x63c   : > { %v1180_v31 = vmul.f32 1.442695, %v1177_v30 }
 0x63e   : > { %1829 = vpow2.f32 %v1180_v31 }
 0x63f   : > { %1831 = vrcp.f32 %v1184_v32 }
 0x644   : > { %v1830_v33 = vpop.eup %1829 }
 0x645   : > { %v1185_v34 = vsel %vm724_vm9, %v1830_v33, 0.0  ;;  %v1832_v59 = vpop.eup %1831 }
 0x646   : > { %1186 = vadd.xlane.f32.xlu1 %v1185_v34  ;;  %v1190_v35 = vmul.f32 %v1832_v59, %v1828_v18 }
 0x648   : > { %v1192_v38 = vpack.c.bf16 %v1190_v35, %v1190_v35 }
 0x64a   : > { %v1195_v36 = vpop.permute.xlu0 %1194 }
 0x64b   : > { %v1200_v37 = vsel %vm797_vm10, %v1195_v36, 0 }
 0x64c   : > { %1209 = vmatpush.bf16.msrb.mxu1 %v1200_v37 }
 0x64f   : > { %1693 = vmatmul.msk.bf16.vlgmr.msrb.gmra.mxu1 %vm724_vm9, %v1192_v38  ;;  %v1794_v38 = vld [vmem:[%s582_s20] ss:$0 sm:$0xff] }
 0x65f   : > { %1215 = vrot.lane.b32.xlu1 %v2087_v0, %s1898_s19  ;;  %v1241_v0 = vsel %vm797_vm10, %v718_v49, 0  ;;  %v1795_v49 = vld [vmem:[%s590_s5] ss:$0 sm:$0xff] }
 0x660   : > { %1250 = vmatpush.bf16.msrb.mxu3 %v1241_v0  ;;  %v1755_v0 = vld [vmem:[%s2034_s14 + $0x18] sm:$0xff] }
 0x698   : > { %v1117_v39 = vpop.f32.mrf.mxu2 }
 0x699   : > { %v1122_v40 = vadd.f32 %v1117_v39, %v2154_v51 }
 0x6a0   : > { %v1119_v50 = vpop.f32.mrf.mxu2 }
 0x6a1   : > { %v1123_v61 = vadd.f32 %v1119_v50, %v987_v58  ;;  %v1752_v58 = vld [vmem:[%s2034_s14] sm:$0xff] }
 0x6b9   : > { %v1187_v41 = vpop.xlane.xlu1 %1186 }
 0x6ba   : > { %1833 = vrcp.f32 %v1187_v41 }
 0x6c0   : > { %v1834_v43 = vpop.eup %1833 }
 0x6c1   : > { %v1191_v44 = vmul.f32 %v1834_v43, %v1830_v33 }
 0x6c3   : > { %v1193_v47 = vpack.c.bf16 %v1191_v44, %v1191_v44 }
 0x6cc   : > { %v1211_v42 = vpop.f32.mrf.mxu1 }
 0x6d1   : > { %v1216_v45 = vpop.permute.xlu1 %1215 }
 0x6d2   : > { %v1221_v46 = vsel %vm797_vm10, %v1216_v45, 0  ;;  %v1759_v45 = vld [vmem:[%s2034_s14 + $0x38] sm:$0xff] }
 0x6d3   : > { %1230 = vmatpush.bf16.msrb.mxu2 %v1221_v46  ;;  %1472 = vmatpush.bf16.msra.mxu1 %v1759_v45  ;;  %v1758_v46 = vld [vmem:[%s2034_s14 + $0x30] sm:$0xff] }
 0x6d4   : > { %v1213_v48 = vpop.f32.mrf.mxu1 }
 0x6d5   : > { %v1756_v48 = vld [vmem:[%s2034_s14 + $0x20] sm:$0xff] }
 0x6d6   : > { %1694 = vmatmul.msk.bf16.vlgmr.msrb.gmra.mxu2 %vm724_vm9, %v1193_v47  ;;  %v1757_v47 = vld [vmem:[%s2034_s14 + $0x28] sm:$0xff] }
 0x6d7   : > { %1473 = vmatpush.bf16.msra.mxu1 %v1758_v46 }
 0x6db   : > { %1474 = vmatpush.bf16.msra.mxu1 %v1757_v47 }
 0x6df   : > { %1475 = vmatpush.bf16.msra.mxu1 %v1756_v48 }
 0x6e3   : > { %1476 = vmatpush.bf16.msra.mxu1 %v1755_v0 }
 0x759   : > { %v1232_v51 = vpop.f32.mrf.mxu2 }
 0x75a   : > { %v1236_v52 = vpack.c.bf16 %v1232_v51, %v1211_v42 }
 0x75c   : > { %1695 = vmatmul.msk.bf16.vlgmr.msrb.gmra.mxu3 %vm724_vm9, %v1236_v52  ;;  %v1754_v52 = vld [vmem:[%s2034_s14 + $0x10] sm:$0xff] }
 0x75d   : > { %1477 = vmatpush.bf16.msra.mxu1 %v1754_v52 }
 0x761   : > { %v1234_v53 = vpop.f32.mrf.mxu2 }
 0x7df   : > { %v1252_v54 = vpop.f32.mrf.mxu3 }
 0x7e0   : > { %v1257_v55 = vadd.f32 %v1252_v54, %v1122_v40 }
 0x7e2   : > { %v1259_v57 = vadd.f32 %v1257_v55, %v2047_v2  ;;  %v1753_v55 = vld [vmem:[%s2034_s14 + $0x8] sm:$0xff] }
 0x7e3   : > { %1478 = vmatpush.bf16.msra.mxu1 %v1753_v55 }
 0x7e4   : > { %v2187_v60 = vadd.f32 %v1792_v56, %v1259_v57 }
 0x7e6   : > { %v1269_v62 = vsel %vm613_vm1, %v2187_v60, 0.0 }
 0x7e7   : > { %1270 = vadd.xlane.f32.xlu2 %v1269_v62  ;;  %v1254_v63 = vpop.f32.mrf.mxu3  ;;  %1479 = vmatpush.bf16.msra.mxu1 %v1752_v58 }
 0x7e8   : > { %v1258_v1 = vadd.f32 %v1254_v63, %v1123_v61 }
 0x7ea   : > { %v1260_v3 = vadd.f32 %v1258_v1, %v2051_v4 }
 0x7ec   : > { %v2192_v5 = vadd.f32 %v1792_v56, %v1260_v3 }
 0x7ee   : > { %v1272_v6 = vsel %vm613_vm1, %v2192_v5, 0.0 }
 0x7ef   : > { %1273 = vadd.xlane.f32.xlu2 %v1272_v6 }
 0x85a   : > { %v1271_v2 = vpop.xlane.xlu2 %1270 }
 0x85b   : > { %v1275_v7 = vmul.f32 %v1271_v2, %v2055_v12 }
 0x85d   : > { %v1277_v8 = vsub.f32 %v2187_v60, %v1275_v7 }
 0x85f   : > { %v1279_v9 = vmul.f32 %v1277_v8, %v1277_v8 }
 0x861   : > { %v1281_v10 = vsel %vm613_vm1, %v1279_v9, 0.0 }
 0x862   : > { %1282 = vadd.xlane.f32.xlu1 %v1281_v10  ;;  %v1274_v11 = vpop.xlane.xlu2 %1273 }
 0x863   : > { %v1276_v4 = vmul.f32 %v1274_v11, %v2055_v12 }
 0x865   : > { %v1278_v13 = vsub.f32 %v2192_v5, %v1276_v4 }
 0x867   : > { %v1280_v14 = vmul.f32 %v1278_v13, %v1278_v13 }
 0x869   : > { %v1284_v15 = vsel %vm613_vm1, %v1280_v14, 0.0 }
 0x86a   : > { %1285 = vadd.xlane.f32.xlu0 %v1284_v15 }
 0x8d5   : > { %v1283_v17 = vpop.xlane.xlu1 %1282 }
 0x8d6   : > { %v1287_v18 = vmul.f32 %v1283_v17, %v2055_v12 }
 0x8d8   : > { %v1289_v19 = vadd.f32 1e-05, %v1287_v18 }
 0x8da   : > { %1835 = vrsqrt.f32 %v1289_v19  ;;  %vm1297_vm12 = vweird.f32 %v1289_v19 }
 0x8dd   : > { %v1286_v21 = vpop.xlane.xlu0 %1285 }
 0x8de   : > { %v1288_v22 = vmul.f32 %v1286_v21, %v2055_v12  ;;  %v1793_v12 = vld [vmem:[%s579_s13] ss:$0 sm:$0xff] }
 0x8e0   : > { %v1836_v23 = vpop.eup %1835  ;;  %v1290_v24 = vadd.f32 1e-05, %v1288_v22 }
 0x8e1   : > { %v1292_v25 = vmul.f32 %v1836_v23, %v1289_v19  ;;  %vm1298_vm11 = vweird.f32 %v1836_v23 }
 0x8e2   : > { %1837 = vrsqrt.f32 %v1290_v24  ;;  %vm1299_vm13 = vmor %vm1297_vm12, %vm1298_vm11  ;;  %vm1307_vm15 = vweird.f32 %v1290_v24 }
 0x8e3   : > { %v1293_v26 = vmul.f32 %v1836_v23, %v1292_v25 }
 0x8e5   : > { %v1294_v27 = vmul.f32 0.5, %v1293_v26 }
 0x8e7   : > { %v1295_v28 = vsub.f32 1.5, %v1294_v27 }
 0x8e8   : > { %v1838_v29 = vpop.eup %1837 }
 0x8e9   : > { %v1296_v30 = vmul.f32 %v1836_v23, %v1295_v28  ;;  %v1302_v31 = vmul.f32 %v1838_v29, %v1290_v24  ;;  %vm1308_vm14 = vweird.f32 %v1838_v29 }
 0x8ea   : > { %vm1309_vm0 = vmor %vm1307_vm15, %vm1308_vm14 }
 0x8eb   : > { %v1303_v32 = vmul.f32 %v1838_v29, %v1302_v31  ;;  %v1300_v33 = vsel %vm1299_vm13, %v1836_v23, %v1296_v30 }
 0x8ec   : > { %v1311_v35 = vmul.f32 %v1300_v33, %v1277_v8 }
 0x8ed   : > { %v1304_v34 = vmul.f32 0.5, %v1303_v32 }
 0x8ee   : > { %v1316_v39 = vmul.f32 %v1793_v12, %v1311_v35 }
 0x8ef   : > { %v1305_v59 = vsub.f32 1.5, %v1304_v34 }
 0x8f0   : > { %v1321_v42 = vadd.f32 %v1794_v38, %v1316_v39 }
 0x8f1   : > { %v1306_v36 = vmul.f32 %v1838_v29, %v1305_v59 }
 0x8f3   : > { %v1310_v37 = vsel %vm1309_vm0, %v1838_v29, %v1306_v36  ;;  %v1796_v29 = vld [vmem:[%s598_s18] ss:$0 sm:$0xff] }
 0x8f4   : > { %v1312_v40 = vmul.f32 %v1310_v37, %v1278_v13 }
 0x8f6   : > { %v1317_v41 = vmul.f32 %v1793_v12, %v1312_v40 }
 0x8f8   : > { %v1322_v43 = vadd.f32 %v1794_v38, %v1317_v41 }
 0x8fa   : > { %v1323_v44 = vpack.c.bf16 %v1322_v43, %v1321_v42 }
 0x8fc   : > { %1704 = vmatmul.msk.bf16.vlgmr.msrb.gmra.mxu0 %vm613_vm1, %v1323_v44 }
 0x979   : > { %v1356_v50 = vpop.f32.mrf.mxu0 }
 0x97a   : > { %v1357_v51 = vadd.f32 %v1795_v49, %v1356_v50 }
 0x97c   : > { %v1705_v53 = vmul.f32 -1.702, %v1357_v51 }
 0x97e   : > { %v1365_v54 = vmul.f32 1.442695, %v1705_v53 }
 0x980   : > { %1839 = vpow2.f32 %v1365_v54 }
 0x981   : > { %v1358_v56 = vpop.f32.mrf.mxu0 }
 0x982   : > { %v1359_v57 = vadd.f32 %v1795_v49, %v1358_v56 }
 0x984   : > { %v1706_v61 = vmul.f32 -1.702, %v1359_v57 }
 0x986   : > { %v1840_v62 = vpop.eup %1839  ;;  %v1367_v63 = vmul.f32 1.442695, %v1706_v61 }
 0x987   : > { %v1369_v1 = vadd.f32 1.0, %v1840_v62 }
 0x988   : > { %1841 = vpow2.f32 %v1367_v63 }
 0x989   : > { %1843 = vrcp.f32 %v1369_v1  ;;  %v1382_v13 = vand.u32 2147483648, %v1369_v1  ;;  %vm1376_vm3 = vweird.f32 %v1369_v1  ;;  %v1380_v14 = vand.u32 2147483647, %v1369_v1 }
 0x98b   : > { %v1383_v20 = vor.u32 1.1754944e-38, %v1382_v13  ;;  %vm1381_vm6 = vcmp.eq.f32.partialorder %v1380_v14, 8.507059e+37 }
 0x98e   : > { %v1842_v3 = vpop.eup %1841 }
 0x98f   : > { %v1844_v6 = vpop.eup %1843  ;;  %v1370_v2 = vadd.f32 1.0, %v1842_v3 }
 0x990   : > { %v1372_v7 = vmul.f32 %v1844_v6, %v1369_v1  ;;  %vm1377_vm2 = vweird.f32 %v1844_v6 }
 0x991   : > { %1845 = vrcp.f32 %v1370_v2  ;;  %vm1378_vm4 = vmor %vm1376_vm3, %vm1377_vm2  ;;  %v1397_v16 = vand.u32 2147483648, %v1370_v2  ;;  %v1395_v19 = vand.u32 2147483647, %v1370_v2  ;;  %vm1391_vm7 = vweird.f32 %v1370_v2 }
 0x992   : > { %v1373_v8 = vsub.f32 1.0, %v1372_v7 }
 0x993   : > { %v1398_v23 = vor.u32 1.1754944e-38, %v1397_v16  ;;  %vm1396_vm9 = vcmp.eq.f32.partialorder %v1395_v19, 8.507059e+37 }
 0x994   : > { %v1374_v9 = vmul.f32 %v1844_v6, %v1373_v8 }
 0x996   : > { %v1375_v11 = vadd.f32 %v1844_v6, %v1374_v9 }
 0x997   : > { %v1846_v10 = vpop.eup %1845 }
 0x998   : > { %v1387_v4 = vmul.f32 %v1846_v10, %v1370_v2  ;;  %v1379_v17 = vsel %vm1378_vm4, %v1844_v6, %v1375_v11  ;;  %vm1392_vm5 = vweird.f32 %v1846_v10 }
 0x999   : > { %v1384_v22 = vsel %vm1381_vm6, %v1383_v20, %v1379_v17  ;;  %vm1393_vm8 = vmor %vm1391_vm7, %vm1392_vm5 }
 0x99a   : > { %v1388_v15 = vsub.f32 1.0, %v1387_v4  ;;  %v1401_v26 = vmul.f32 %v1384_v22, %v1357_v51 }
 0x99c   : > { %v1389_v18 = vmul.f32 %v1846_v10, %v1388_v15 }
 0x99e   : > { %v1390_v21 = vadd.f32 %v1846_v10, %v1389_v18 }
 0x9a0   : > { %v1394_v24 = vsel %vm1393_vm8, %v1846_v10, %v1390_v21 }
 0x9a1   : > { %v1399_v25 = vsel %vm1396_vm9, %v1398_v23, %v1394_v24 }
 0x9a2   : > { %v1402_v27 = vmul.f32 %v1399_v25, %v1359_v57 }
 0x9a4   : > { %v1403_v28 = vpack.c.bf16 %v1402_v27, %v1401_v26 }
 0x9a6   : > { %1480 = vmatmul.bf16.vlgmr.msra.gmra.mxu1 %v1403_v28 }
 0xa23   : > { %v1481_v30 = vpop.f32.mrf.mxu1 }
 0xa24   : > { %v1482_v31 = vadd.f32 %v1796_v29, %v1481_v30 }
 0xa26   : > { %v1486_v32 = vadd.f32 %v1482_v31, %v2187_v60 }
 0xa28   : > { %1488 = vst.msk [vmem:[#allocation2] sm:$0xff] %vm613_vm1, %v1486_v32 }
 0xa2b   : > { %v1483_v33 = vpop.f32.mrf.mxu1 }
 0xa2c   : > { %v1484_v34 = vadd.f32 %v1796_v29, %v1483_v33  ;;  %1493 = sbr.rel (%p1739_p5) target bundleno = 2611 (0xa33), region = 80 }
 0xa2e   : > { %v1487_v59 = vadd.f32 %v1484_v34, %v2192_v5 }
 0xa30   : > { %1489 = vst.msk [vmem:[#allocation2 + $0x8] sm:$0xff] %vm613_vm1, %v1487_v59 }
 0xa31   : > { %1494 = vst.msk [vmem:[#allocation3] sm:$0xff] %vm613_vm1, %v1486_v32 }
 0xa32   : > { %1495 = vst.msk [vmem:[#allocation3 + $0x8] sm:$0xff] %vm613_vm1, %v1487_v59 }
 0xa33 PF: > { %p1764_p6 = scmp.eq.s32.totalorder %s1978_s26, 1  ;;  %s1899_s27 = smov [#allocation3]  }
 0xa34   : > { %s1501_s18 = sshll.u32 %s1899_s27, 4  ;;  %s2277_s30 = sld [smem:[#allocation10_spill]]  ;;  %s1502_s18 = int_to_ptr.vmem [resolvable:$true] %s1501_s18 }
 0xa35   : > { %s1900_s15 = smov 128   ;;  %s1901_s19 = smov 8  }
 0xa3a   : > { %s1503_s16 = sshll.u32 %s2277_s30, 4  ;;  %s1504_s16 = int_to_ptr.hbm [resolvable:$true] %s1503_s16 }
 0xa3b   : > { %1761 = dma.vmem_to_hbm [thread:$0]  (%p1764_p6), %s1502_s18, 256, %s1504_s16, [#allocation4], %s1900_s15, %s1900_s15, %s1901_s19  }
 0xa3c   : > { %1880 = dma.done.wait (%p1764_p6), [#allocation4], 256  }
 0xa3d   : > { %1882 = vsyncadd (%p1764_p6), [#allocation4], 4294967040 }
 0xa3e PF: > { %s2278_s17 = sld [smem:[#allocation6_spill]] }
 0xa44   : > { %s24_s25 = sadd.s32 1, %s2278_s17  }
 0xa45   : > { %p21_p7 = scmp.ge.s32.totalorder %s24_s25, 4  }
 0xa47   :  { %23 = sbr.rel (!%p21_p7) target bundleno = 5 (0x5), region = 140 }
 0xa4c   :  { %1520 = vsyncpa [#allocation4], 1 }
 0xa4d   :  { %1522 = vsyncpa [#allocation4 + $0x1], 1 }

</bundles_post_ra>
